<compile_context>
chip_gen: v7x
topology: tpu7x:2x2x1
jax: 0.10.0
libtpu: 0.0.40
codegen_flags: <defaults>
</compile_context>

<pallas_src>
import jax
import jax.numpy as jnp
from jax import lax
from jax.experimental import pallas as pl
from jax.experimental.pallas import tpu as pltpu

EPS = 1e-3


def _tcs_per_chip():
    # v7x has 2 TensorCores per chip; v5e / v6e have 1.
    try:
        kind = jax.devices()[0].device_kind.lower()
        if "v7" in kind:
            return 2
    except Exception:
        pass
    return 1


def _pick_row_chunk(c_out_blk):
    # Largest channel-chunk (multiple of 8 sublanes) dividing c_out_blk.
    for r in (40, 32, 24, 16, 8):
        if c_out_blk % r == 0:
            return r
    return c_out_blk  # fallback: single chunk


def _make_kernel(c_out_blk, c_in, m, r_chunk, eps):
    n_chunks = c_out_blk // r_chunk
    inv_m = 1.0 / float(m)

    def kernel(w_ref, x_ref, gb_ref, o_ref, xb_ref, wb_ref):
        # w_ref:  (c_out_blk, c_in) f32
        # x_ref:  (c_in, m)         f32   (N=1 NCHW flattened; lanes = H*W)
        # gb_ref: (c_out_blk, 2)    f32   [:, 0]=gamma, [:, 1]=beta
        # o_ref:  (c_out_blk, m)    f32
        # xb_ref: (c_in, m)         bf16 VMEM scratch (stationary matmul RHS)
        # wb_ref: (c_out_blk, c_in) bf16 VMEM scratch (hoisted weight cast)

        # Cast matmul operands to bf16 ONCE (f32 matmul is emulated on the MXU);
        # both casts are hoisted out of the channel-chunk loop.
        xb_ref[...] = x_ref[...].astype(jnp.bfloat16)
        wb_ref[...] = w_ref[...].astype(jnp.bfloat16)

        def body(i, carry):
            r0 = pl.multiple_of(i * r_chunk, 8)

            # 1x1 conv == matmul on the MXU, one channel chunk at a time so the
            # (c_out_blk, m) f32 result is never fully live in vregs.
            y = jnp.dot(wb_ref[pl.ds(r0, r_chunk), :], xb_ref[...],
                        preferred_element_type=jnp.float32)           # (r, m)

            # BatchNorm training-mode batch stats, single pass:
            #   var = E[y^2] - mean^2, folded into one scale/shift.
            s = jnp.sum(y, axis=1, keepdims=True)                     # (r, 1)
            ss = jnp.sum(y * y, axis=1, keepdims=True)                # (r, 1)
            mean = s * inv_m
            var = ss * inv_m - mean * mean

            gb = gb_ref[pl.ds(r0, r_chunk), :]                        # (r, 2)
            scale = gb[:, 0:1] * lax.rsqrt(var + eps)
            shift = gb[:, 1:2] - mean * scale

            # affine + ReLU; lane-dense store (last dim = H*W).
            out = jnp.maximum(y * scale + shift, 0.0)
            o_ref[pl.ds(r0, r_chunk), :] = out.astype(o_ref.dtype)
            return carry

        lax.fori_loop(0, n_chunks, body, 0, unroll=True)

    return kernel


@jax.jit
def conv_bn_relu(x_nchw, w_conv, gamma, beta):
    """x_nchw: (1, C_in, H, W); w_conv: (C_out, C_in, 1, 1); gamma/beta: (C_out,)"""
    n, c_in, h, w = x_nchw.shape
    assert n == 1, "kernel assumes batch size 1 (as in the reference module)"
    c_out = w_conv.shape[0]
    m = n * h * w

    # All free reshapes (no transposes) for N=1, NCHW layout.
    x_mat = x_nchw.reshape(c_in, m)            # (C_in, H*W)
    w_mat = w_conv.reshape(c_out, c_in)        # (C_out, C_in)
    gb = jnp.stack([gamma, beta], axis=1)      # (C_out, 2) packed affine params

    # v7x: split output channels across the two TensorCores (3 blocks of 40,
    # "parallel").  v5e/v6e: keep a single grid step — extra steps only add
    # per-step overhead for this tiny problem.
    n_blocks = 3 if (_tcs_per_chip() == 2 and c_out % 3 == 0 and (c_out // 3) % 8 == 0) else 1
    c_out_blk = c_out // n_blocks
    r_chunk = _pick_row_chunk(c_out_blk)
    kernel = _make_kernel(c_out_blk, c_in, m, r_chunk, EPS)

    out_mat = pl.pallas_call(
        kernel,
        out_shape=jax.ShapeDtypeStruct((c_out, m), x_nchw.dtype),
        grid_spec=pltpu.PrefetchScalarGridSpec(
            num_scalar_prefetch=0,
            grid=(n_blocks,),
            in_specs=[
                pl.BlockSpec((c_out_blk, c_in), lambda i: (i, 0)),
                pl.BlockSpec((c_in, m), lambda i: (0, 0)),
                pl.BlockSpec((c_out_blk, 2), lambda i: (i, 0)),
            ],
            out_specs=pl.BlockSpec((c_out_blk, m), lambda i: (i, 0)),
            scratch_shapes=[
                pltpu.VMEM((c_in, m), jnp.bfloat16),
                pltpu.VMEM((c_out_blk, c_in), jnp.bfloat16),
            ],
        ),
        compiler_params=pltpu.CompilerParams(
            dimension_semantics=("parallel",)
        ),
    )(w_mat, x_mat, gb)

    # (C_out, H*W) -> (1, C_out, H, W): free reshape.
    return out_mat.reshape(n, c_out, h, w)


if __name__ == "__main__":
    key = jax.random.PRNGKey(0)
    kx, kw, kg, kb = jax.random.split(key, 4)

    # Shapes implied by the module's forward: x55 = randn(1, 40, 28, 28)
    N, C_IN, H, W = 1, 40, 28, 28
    C_OUT = 120

    x = jax.random.normal(kx, (N, C_IN, H, W), dtype=jnp.float32)
    # Conv2d(40, 120, 1, bias=False) weight: (120, 40, 1, 1)
    w_conv = jax.random.normal(kw, (C_OUT, C_IN, 1, 1), dtype=jnp.float32) * 0.1
    # BatchNorm2d affine params (deterministic non-trivial init)
    gamma = 1.0 + 0.1 * jax.random.normal(kg, (C_OUT,), dtype=jnp.float32)
    beta = 0.1 * jax.random.normal(kb, (C_OUT,), dtype=jnp.float32)

    out = conv_bn_relu(x, w_conv, gamma, beta)
    jax.block_until_ready(out)

    # Pure-JAX f32 reference; loose tolerance since matmul inputs are bf16.
    def ref_fn(x, w_conv, gamma, beta):
        y = jnp.einsum("nchw,oc->nohw", x, w_conv.reshape(C_OUT, C_IN))
        mean = jnp.mean(y, axis=(0, 2, 3), keepdims=True)
        var = jnp.mean((y - mean) ** 2, axis=(0, 2, 3), keepdims=True)
        y_hat = (y - mean) * lax.rsqrt(var + EPS)
        o = y_hat * gamma.reshape(1, C_OUT, 1, 1) + beta.reshape(1, C_OUT, 1, 1)
        return jnp.maximum(o, 0.0)

    ref = ref_fn(x, w_conv, gamma, beta)
    max_err = float(jnp.max(jnp.abs(out - ref)))

    assert out.shape == (N, C_OUT, H, W), out.shape
    assert bool(jnp.all(out >= 0.0))        # ReLU
    assert max_err < 0.1, max_err           # bf16 MXU inputs -> loose tolerance
    print("KERNEL_OK")
</pallas_src>

<mosaic_0001>
module attributes {stable_mosaic.version = 11 : i64} {
  func.func @kernel(%arg0: i32, %arg1: memref<120x40xf32, #tpu.memory_space<vmem>>, %arg2: memref<40x784xf32, #tpu.memory_space<vmem>>, %arg3: memref<120x2xf32, #tpu.memory_space<vmem>>, %arg4: memref<120x784xf32, #tpu.memory_space<vmem>>, %arg5: memref<40x784xbf16, #tpu.memory_space<vmem>>, %arg6: memref<120x40xbf16, #tpu.memory_space<vmem>>) attributes {dimension_semantics = [#tpu.dimension_semantics<parallel>], iteration_bounds = array<i64: 1>, scalar_prefetch = 0 : i64, scratch_operands = 2 : i64, tpu.core_type = #tpu.core_type<tc>, window_params = [{transform_indices = @transform_0, window_bounds = array<i64: 120, 40>}, {pipeline_mode = #tpu.pipeline_mode<synchronous>, transform_indices = @transform_1, window_bounds = array<i64: 40, 784>}, {transform_indices = @transform_2, window_bounds = array<i64: 120, 2>}, {transform_indices = @transform_3, window_bounds = array<i64: 120, 784>}]} {
    %c0 = arith.constant 0 : index
    %c0_0 = arith.constant 0 : index
    %0 = vector.load %arg2[%c0, %c0_0] : memref<40x784xf32, #tpu.memory_space<vmem>>, vector<40x784xf32>
    %1 = arith.truncf %0 : vector<40x784xf32> to vector<40x784xbf16>
    %c0_1 = arith.constant 0 : index
    %c0_2 = arith.constant 0 : index
    %2 = vector.load %arg5[%c0_1, %c0_2] : memref<40x784xbf16, #tpu.memory_space<vmem>>, vector<40x784xbf16>
    tpu.vector_store %arg5[%c0_1, %c0_2], %1 {strides = array<i32>} : memref<40x784xbf16, #tpu.memory_space<vmem>>, vector<40x784xbf16>,
    %c0_3 = arith.constant 0 : index
    %c0_4 = arith.constant 0 : index
    %3 = vector.load %arg1[%c0_3, %c0_4] : memref<120x40xf32, #tpu.memory_space<vmem>>, vector<120x40xf32>
    %4 = arith.truncf %3 : vector<120x40xf32> to vector<120x40xbf16>
    %c0_5 = arith.constant 0 : index
    %c0_6 = arith.constant 0 : index
    %5 = vector.load %arg6[%c0_5, %c0_6] : memref<120x40xbf16, #tpu.memory_space<vmem>>, vector<120x40xbf16>
    tpu.vector_store %arg6[%c0_5, %c0_6], %4 {strides = array<i32>} : memref<120x40xbf16, #tpu.memory_space<vmem>>, vector<120x40xbf16>,
    %c0_i32 = arith.constant 0 : i32
    %c40_i32 = arith.constant 40 : i32
    %6 = arith.muli %c0_i32, %c40_i32 : i32
    %7 = tpu.assume_multiple %6, 8 : i32
    %8 = arith.index_cast %7 : i32 to index
    %c0_7 = arith.constant 0 : index
    %9 = vector.load %arg6[%8, %c0_7] : memref<120x40xbf16, #tpu.memory_space<vmem>>, vector<40x40xbf16>
    %c0_8 = arith.constant 0 : index
    %c0_9 = arith.constant 0 : index
    %10 = vector.load %arg5[%c0_8, %c0_9] : memref<40x784xbf16, #tpu.memory_space<vmem>>, vector<40x784xbf16>
    %cst = arith.constant dense<0.000000e+00> : vector<40x784xf32>
    %11 = tpu.matmul %9, %10, %cst {dimension_numbers = #tpu.dot_dimension_numbers<[1], [0], [0], [1], [0, 0, 1, 1], [], []>} : vector<40x40xbf16>, vector<40x784xbf16>, vector<40x784xf32> -> vector<40x784xf32>
    %cst_10 = arith.constant dense<0.000000e+00> : vector<40xf32>
    %12 = vector.multi_reduction <add>, %11, %cst_10 [1] : vector<40x784xf32> to vector<40xf32>
    %13 = vector.shape_cast %12 : vector<40xf32> to vector<40x1xf32>
    %14 = arith.mulf %11, %11 : vector<40x784xf32>
    %cst_11 = arith.constant dense<0.000000e+00> : vector<40xf32>
    %15 = vector.multi_reduction <add>, %14, %cst_11 [1] : vector<40x784xf32> to vector<40xf32>
    %16 = vector.shape_cast %15 : vector<40xf32> to vector<40x1xf32>
    %cst_12 = arith.constant 0.00127551018 : f32
    %17 = vector.broadcast %cst_12 : f32 to vector<40x1xf32>
    %18 = arith.mulf %13, %17 : vector<40x1xf32>
    %cst_13 = arith.constant 0.00127551018 : f32
    %19 = vector.broadcast %cst_13 : f32 to vector<40x1xf32>
    %20 = arith.mulf %16, %19 : vector<40x1xf32>
    %21 = arith.mulf %18, %18 : vector<40x1xf32>
    %22 = arith.subf %20, %21 : vector<40x1xf32>
    %23 = arith.index_cast %7 : i32 to index
    %c0_14 = arith.constant 0 : index
    %24 = vector.load %arg3[%23, %c0_14] : memref<120x2xf32, #tpu.memory_space<vmem>>, vector<40x2xf32>
    %25 = vector.extract_strided_slice %24 {offsets = [0, 0], sizes = [40, 1], strides = [1, 1]} : vector<40x2xf32> to vector<40x1xf32>
    %cst_15 = arith.constant 1.000000e-03 : f32
    %26 = vector.broadcast %cst_15 : f32 to vector<40x1xf32>
    %27 = arith.addf %22, %26 : vector<40x1xf32>
    %28 = math.rsqrt %27 : vector<40x1xf32>
    %29 = arith.mulf %25, %28 : vector<40x1xf32>
    %30 = vector.extract_strided_slice %24 {offsets = [0, 1], sizes = [40, 1], strides = [1, 1]} : vector<40x2xf32> to vector<40x1xf32>
    %31 = arith.mulf %18, %29 : vector<40x1xf32>
    %32 = arith.subf %30, %31 : vector<40x1xf32>
    %33 = vector.broadcast %29 : vector<40x1xf32> to vector<40x784xf32>
    %34 = arith.mulf %11, %33 : vector<40x784xf32>
    %35 = vector.broadcast %32 : vector<40x1xf32> to vector<40x784xf32>
    %36 = arith.addf %34, %35 : vector<40x784xf32>
    %cst_16 = arith.constant 0.000000e+00 : f32
    %37 = vector.broadcast %cst_16 : f32 to vector<40x784xf32>
    %38 = arith.maximumf %36, %37 : vector<40x784xf32>
    %39 = arith.index_cast %7 : i32 to index
    %c0_17 = arith.constant 0 : index
    %40 = vector.load %arg4[%39, %c0_17] : memref<120x784xf32, #tpu.memory_space<vmem>>, vector<40x784xf32>
    tpu.vector_store %arg4[%39, %c0_17], %38 {strides = array<i32>} : memref<120x784xf32, #tpu.memory_space<vmem>>, vector<40x784xf32>,
    %c1_i32 = arith.constant 1 : i32
    %c40_i32_18 = arith.constant 40 : i32
    %41 = arith.muli %c1_i32, %c40_i32_18 : i32
    %42 = tpu.assume_multiple %41, 8 : i32
    %43 = arith.index_cast %42 : i32 to index
    %c0_19 = arith.constant 0 : index
    %44 = vector.load %arg6[%43, %c0_19] : memref<120x40xbf16, #tpu.memory_space<vmem>>, vector<40x40xbf16>
    %c0_20 = arith.constant 0 : index
    %c0_21 = arith.constant 0 : index
    %45 = vector.load %arg5[%c0_20, %c0_21] : memref<40x784xbf16, #tpu.memory_space<vmem>>, vector<40x784xbf16>
    %cst_22 = arith.constant dense<0.000000e+00> : vector<40x784xf32>
    %46 = tpu.matmul %44, %45, %cst_22 {dimension_numbers = #tpu.dot_dimension_numbers<[1], [0], [0], [1], [0, 0, 1, 1], [], []>} : vector<40x40xbf16>, vector<40x784xbf16>, vector<40x784xf32> -> vector<40x784xf32>
    %cst_23 = arith.constant dense<0.000000e+00> : vector<40xf32>
    %47 = vector.multi_reduction <add>, %46, %cst_23 [1] : vector<40x784xf32> to vector<40xf32>
    %48 = vector.shape_cast %47 : vector<40xf32> to vector<40x1xf32>
    %49 = arith.mulf %46, %46 : vector<40x784xf32>
    %cst_24 = arith.constant dense<0.000000e+00> : vector<40xf32>
    %50 = vector.multi_reduction <add>, %49, %cst_24 [1] : vector<40x784xf32> to vector<40xf32>
    %51 = vector.shape_cast %50 : vector<40xf32> to vector<40x1xf32>
    %cst_25 = arith.constant 0.00127551018 : f32
    %52 = vector.broadcast %cst_25 : f32 to vector<40x1xf32>
    %53 = arith.mulf %48, %52 : vector<40x1xf32>
    %cst_26 = arith.constant 0.00127551018 : f32
    %54 = vector.broadcast %cst_26 : f32 to vector<40x1xf32>
    %55 = arith.mulf %51, %54 : vector<40x1xf32>
    %56 = arith.mulf %53, %53 : vector<40x1xf32>
    %57 = arith.subf %55, %56 : vector<40x1xf32>
    %58 = arith.index_cast %42 : i32 to index
    %c0_27 = arith.constant 0 : index
    %59 = vector.load %arg3[%58, %c0_27] : memref<120x2xf32, #tpu.memory_space<vmem>>, vector<40x2xf32>
    %60 = vector.extract_strided_slice %59 {offsets = [0, 0], sizes = [40, 1], strides = [1, 1]} : vector<40x2xf32> to vector<40x1xf32>
    %cst_28 = arith.constant 1.000000e-03 : f32
    %61 = vector.broadcast %cst_28 : f32 to vector<40x1xf32>
    %62 = arith.addf %57, %61 : vector<40x1xf32>
    %63 = math.rsqrt %62 : vector<40x1xf32>
    %64 = arith.mulf %60, %63 : vector<40x1xf32>
    %65 = vector.extract_strided_slice %59 {offsets = [0, 1], sizes = [40, 1], strides = [1, 1]} : vector<40x2xf32> to vector<40x1xf32>
    %66 = arith.mulf %53, %64 : vector<40x1xf32>
    %67 = arith.subf %65, %66 : vector<40x1xf32>
    %68 = vector.broadcast %64 : vector<40x1xf32> to vector<40x784xf32>
    %69 = arith.mulf %46, %68 : vector<40x784xf32>
    %70 = vector.broadcast %67 : vector<40x1xf32> to vector<40x784xf32>
    %71 = arith.addf %69, %70 : vector<40x784xf32>
    %cst_29 = arith.constant 0.000000e+00 : f32
    %72 = vector.broadcast %cst_29 : f32 to vector<40x784xf32>
    %73 = arith.maximumf %71, %72 : vector<40x784xf32>
    %74 = arith.index_cast %42 : i32 to index
    %c0_30 = arith.constant 0 : index
    %75 = vector.load %arg4[%74, %c0_30] : memref<120x784xf32, #tpu.memory_space<vmem>>, vector<40x784xf32>
    tpu.vector_store %arg4[%74, %c0_30], %73 {strides = array<i32>} : memref<120x784xf32, #tpu.memory_space<vmem>>, vector<40x784xf32>,
    %c2_i32 = arith.constant 2 : i32
    %c40_i32_31 = arith.constant 40 : i32
    %76 = arith.muli %c2_i32, %c40_i32_31 : i32
    %77 = tpu.assume_multiple %76, 8 : i32
    %78 = arith.index_cast %77 : i32 to index
    %c0_32 = arith.constant 0 : index
    %79 = vector.load %arg6[%78, %c0_32] : memref<120x40xbf16, #tpu.memory_space<vmem>>, vector<40x40xbf16>
    %c0_33 = arith.constant 0 : index
    %c0_34 = arith.constant 0 : index
    %80 = vector.load %arg5[%c0_33, %c0_34] : memref<40x784xbf16, #tpu.memory_space<vmem>>, vector<40x784xbf16>
    %cst_35 = arith.constant dense<0.000000e+00> : vector<40x784xf32>
    %81 = tpu.matmul %79, %80, %cst_35 {dimension_numbers = #tpu.dot_dimension_numbers<[1], [0], [0], [1], [0, 0, 1, 1], [], []>} : vector<40x40xbf16>, vector<40x784xbf16>, vector<40x784xf32> -> vector<40x784xf32>
    %cst_36 = arith.constant dense<0.000000e+00> : vector<40xf32>
    %82 = vector.multi_reduction <add>, %81, %cst_36 [1] : vector<40x784xf32> to vector<40xf32>
    %83 = vector.shape_cast %82 : vector<40xf32> to vector<40x1xf32>
    %84 = arith.mulf %81, %81 : vector<40x784xf32>
    %cst_37 = arith.constant dense<0.000000e+00> : vector<40xf32>
    %85 = vector.multi_reduction <add>, %84, %cst_37 [1] : vector<40x784xf32> to vector<40xf32>
    %86 = vector.shape_cast %85 : vector<40xf32> to vector<40x1xf32>
    %cst_38 = arith.constant 0.00127551018 : f32
    %87 = vector.broadcast %cst_38 : f32 to vector<40x1xf32>
    %88 = arith.mulf %83, %87 : vector<40x1xf32>
    %cst_39 = arith.constant 0.00127551018 : f32
    %89 = vector.broadcast %cst_39 : f32 to vector<40x1xf32>
    %90 = arith.mulf %86, %89 : vector<40x1xf32>
    %91 = arith.mulf %88, %88 : vector<40x1xf32>
    %92 = arith.subf %90, %91 : vector<40x1xf32>
    %93 = arith.index_cast %77 : i32 to index
    %c0_40 = arith.constant 0 : index
    %94 = vector.load %arg3[%93, %c0_40] : memref<120x2xf32, #tpu.memory_space<vmem>>, vector<40x2xf32>
    %95 = vector.extract_strided_slice %94 {offsets = [0, 0], sizes = [40, 1], strides = [1, 1]} : vector<40x2xf32> to vector<40x1xf32>
    %cst_41 = arith.constant 1.000000e-03 : f32
    %96 = vector.broadcast %cst_41 : f32 to vector<40x1xf32>
    %97 = arith.addf %92, %96 : vector<40x1xf32>
    %98 = math.rsqrt %97 : vector<40x1xf32>
    %99 = arith.mulf %95, %98 : vector<40x1xf32>
    %100 = vector.extract_strided_slice %94 {offsets = [0, 1], sizes = [40, 1], strides = [1, 1]} : vector<40x2xf32> to vector<40x1xf32>
    %101 = arith.mulf %88, %99 : vector<40x1xf32>
    %102 = arith.subf %100, %101 : vector<40x1xf32>
    %103 = vector.broadcast %99 : vector<40x1xf32> to vector<40x784xf32>
    %104 = arith.mulf %81, %103 : vector<40x784xf32>
    %105 = vector.broadcast %102 : vector<40x1xf32> to vector<40x784xf32>
    %106 = arith.addf %104, %105 : vector<40x784xf32>
    %cst_42 = arith.constant 0.000000e+00 : f32
    %107 = vector.broadcast %cst_42 : f32 to vector<40x784xf32>
    %108 = arith.maximumf %106, %107 : vector<40x784xf32>
    %109 = arith.index_cast %77 : i32 to index
    %c0_43 = arith.constant 0 : index
    %110 = vector.load %arg4[%109, %c0_43] : memref<120x784xf32, #tpu.memory_space<vmem>>, vector<40x784xf32>
    tpu.vector_store %arg4[%109, %c0_43], %108 {strides = array<i32>} : memref<120x784xf32, #tpu.memory_space<vmem>>, vector<40x784xf32>,
    %c3_i32 = arith.constant 3 : i32
    return
  }
  func.func @transform_0(%arg0: i32) -> (i32, i32) {
    %c0_i32 = arith.constant 0 : i32
    %c0_i32_0 = arith.constant 0 : i32
    return %arg0, %c0_i32 : i32, i32
  }
  func.func @transform_1(%arg0: i32) -> (i32, i32) {
    %c0_i32 = arith.constant 0 : i32
    %c0_i32_0 = arith.constant 0 : i32
    %c0_i32_1 = arith.constant 0 : i32
    return %c0_i32, %c0_i32_0 : i32, i32
  }
  func.func @transform_2(%arg0: i32) -> (i32, i32) {
    %c0_i32 = arith.constant 0 : i32
    %c0_i32_0 = arith.constant 0 : i32
    return %arg0, %c0_i32 : i32, i32
  }
  func.func @transform_3(%arg0: i32) -> (i32, i32) {
    %c0_i32 = arith.constant 0 : i32
    %c0_i32_0 = arith.constant 0 : i32
    return %arg0, %c0_i32 : i32, i32
  }
}

</mosaic_0001>

<bundles_post_ra>
// kernel: conv_bn_relu.1
= control target key start
LH: loop header
LB: loop body
LE: loop exit
PB: predicated region body
PF: predicated region fallthrough
CT: control target
= control target key end

     0   :  { %v3062_v3 = vmov 0   ;;  %vm264_vm0 = vcmask 322560   ;;  %vm418_vm1 = vcmask 1043456   ;;  %vm170_vm2 = vcmask 125952   ;;  %s3065_s6 = smov 1   ;;  %s4927_s1 = inlined_call_operand.vmem [shape: f32[40,784], index: 1, kind: input, shape index: {}]   ;;  %s4928_s0 = inlined_call_operand.vmem [shape: f32[120,40], index: 0, kind: input, shape index: {}]   ;;  %s4929_s2 = inlined_call_operand.vmem [shape: f32[120,2], index: 2, kind: input, shape index: {}]   ;;  %s4930_s3 = inlined_call_operand.vmem [shape: f32[120,784], index: 3, kind: output, shape index: {}]  }
   0x1   :  { %v15_v0 = vld [vmem:[%s4927_s1] sm:$0xff]  ;;  %v16_v1 = vld [vmem:[%s4927_s1 + $0x8] sm:$0xff]  ;;  %v22_v2 = vld [vmem:[%s4927_s1 + $0x38] sm:$0xff]  ;;  %472 = vmatprep.mubr.bf16.mxu0 %v3062_v3  ;;  %533 = vmatprep.mubr.bf16.mxu1 %v3062_v3  ;;  %vm408_vm3 = vcmask 326656   ;;  %vm3064_vm4 = vmmov 0   ;;  %vm684_vm5 = vcmask 130048  }
   0x2   :  { %v23_v4 = vld [vmem:[%s4927_s1 + $0x40] sm:$0xff]  ;;  %v17_v5 = vld [vmem:[%s4927_s1 + $0x10] sm:$0xff]  ;;  %v18_v6 = vld [vmem:[%s4927_s1 + $0x18] sm:$0xff]  ;;  %2992 = vset.pattern.permute.xlu1 %v3062_v3  ;;  %2993 = vset.pattern.permute.xlu0 %v3062_v3  ;;  %v3129_v14 = vpack.c.bf16 %v22_v2, %v15_v0 }
   0x3   :  { %v24_v7 = vld [vmem:[%s4927_s1 + $0x48] sm:$0xff]  ;;  %v25_v8 = vld [vmem:[%s4927_s1 + $0x50] sm:$0xff]  ;;  %v30_v10 = vld [vmem:[%s4927_s1 + $0x78] sm:$0xff]  ;;  %v3127_v13 = vpack.c.bf16 %v23_v4, %v16_v1 }
   0x4   :  { %v29_v9 = vld [vmem:[%s4927_s1 + $0x70] sm:$0xff]  ;;  %v36_v11 = vld [vmem:[%s4927_s1 + $0xa8] sm:$0xff]  ;;  %v31_v15 = vld [vmem:[%s4927_s1 + $0x80] sm:$0xff]  ;;  %v3140_v18 = vpack.c.bf16 %v25_v8, %v18_v6  ;;  %v3142_v19 = vpack.c.bf16 %v24_v7, %v17_v5 }
   0x5   :  { %v37_v12 = vld [vmem:[%s4927_s1 + $0xb0] sm:$0xff]  ;;  %v32_v16 = vld [vmem:[%s4927_s1 + $0x88] sm:$0xff]  ;;  %v38_v17 = vld [vmem:[%s4927_s1 + $0xb8] sm:$0xff]  ;;  %440 = vmatprep.subr.bf16.mxu0 %v3127_v13  ;;  %v3167_v27 = vpack.c.bf16 %v36_v11, %v29_v9 }
   0x6   :  { %v39_v20 = vld [vmem:[%s4927_s1 + $0xc0] sm:$0xff]  ;;  %v44_v22 = vld [vmem:[%s4927_s1 + $0xe8] sm:$0xff]  ;;  %v3154_v23 = vpack.c.bf16 %v37_v12, %v30_v10  ;;  %v45_v24 = vld [vmem:[%s4927_s1 + $0xf0] sm:$0xff]  ;;  %441 = vmatpush1.bf16.msra.mxu0 %v3129_v14  ;;  %501 = vmatprep.subr.bf16.mxu1 %v3140_v18  ;;  %v3184_v33 = vpack.c.bf16 %v38_v17, %v31_v15 }
   0x7   :  { %v43_v21 = vld [vmem:[%s4927_s1 + $0xe0] sm:$0xff]  ;;  %v46_v25 = vld [vmem:[%s4927_s1 + $0xf8] sm:$0xff]  ;;  %v189_v28 = vld [vmem:[%s4928_s0 + $0x8] sm:$0xff]  ;;  %502 = vmatpush1.bf16.msra.mxu1 %v3142_v19  ;;  %v3182_v32 = vpack.c.bf16 %v39_v20, %v32_v16  ;;  %v3186_v34 = vpack.c.bf16 %v44_v22, %v44_v22  ;;  %v3055_v40 = vpack.c.bf16 %v45_v24, %v45_v24  ;;  %v3063_v24 = vmov 0.0  }
   0x8   :  { %v188_v26 = vld [vmem:[%s4928_s0] sm:$0xff]  ;;  %v20_v31 = vld [vmem:[%s4927_s1 + $0x28] sm:$0xff]  ;;  %442 = vmatprep.subr.bf16.mxu0 %v3154_v23  ;;  %v26_v35 = vld [vmem:[%s4927_s1 + $0x58] sm:$0xff]  ;;  %v3053_v38 = vpack.c.bf16 %v43_v21, %v43_v21  ;;  %v3197_v39 = vpack.c.bf16 %v46_v25, %v46_v25  ;;  %v2901_v41 = vpack.c.bf16 %v189_v28, %v189_v28 }
   0x9   :  { %v2900_v29 = vpack.c.bf16 %v188_v26, %v188_v26  ;;  %v3175_v30 = vld [vmem:[%s4927_s1 + $0x20] sm:$0xff]  ;;  %v21_v37 = vld [vmem:[%s4927_s1 + $0x30] sm:$0xff]  ;;  %v28_v42 = vld [vmem:[%s4927_s1 + $0x68] sm:$0xff]  ;;  %503 = vmatprep.subr.bf16.mxu1 %v3182_v32  ;;  %v3243_v56 = vsel %vm418_vm1, %v3055_v40, 0 }
   0xa   :  { %v27_v36 = vld [vmem:[%s4927_s1 + $0x60] sm:$0xff]  ;;  %v190_v43 = vld [vmem:[%s4928_s0 + $0x10] sm:$0xff]  ;;  %v191_v44 = vld [vmem:[%s4928_s0 + $0x18] sm:$0xff]  ;;  %v2883_v45 = vpack.c.bf16 %v21_v37, %v21_v37  ;;  %v2887_v46 = vpack.c.bf16 %v28_v42, %v28_v42  ;;  %443 = vmatpush1.bf16.msra.mxu0 %v3167_v27  ;;  %266 = vst.msk [vmem:[#allocation3 + $0x4] sm:$0xf] %vm264_vm0, %v2901_v41  ;;  %v3240_v55 = vsel %vm418_vm1, %v3053_v38, 0  ;;  %v3297_v17 = vpack.c.bf16 %v26_v35, %v3175_v30 }
   0xb   :  { %265 = vst.msk [vmem:[#allocation3] sm:$0xf] %vm264_vm0, %v2900_v29  ;;  %v3213_v47 = vld [vmem:[%s4927_s1 + $0x90] sm:$0xff]  ;;  %v3218_v48 = vld [vmem:[%s4927_s1 + $0x98] sm:$0xff]  ;;  %v3223_v49 = vld [vmem:[%s4927_s1 + $0xc8] sm:$0xff]  ;;  %v2902_v50 = vpack.c.bf16 %v190_v43, %v190_v43  ;;  %v2903_v51 = vpack.c.bf16 %v191_v44, %v191_v44  ;;  %504 = vmatpush1.bf16.msra.mxu1 %v3184_v33  ;;  %2707 = vmatprep.subr.msk.bf16.mxu0 %vm418_vm1, %v3186_v34 }
   0xc   :  { %v41_v52 = vld [vmem:[%s4927_s1 + $0xd0] sm:$0xff]  ;;  %v35_v53 = vld [vmem:[%s4927_s1 + $0xa0] sm:$0xff]  ;;  %v42_v54 = vld [vmem:[%s4927_s1 + $0xd8] sm:$0xff]  ;;  %v3245_v57 = vpack.c.bf16 %v27_v36, %v20_v31  ;;  %171 = vst.msk [vmem:[#allocation2 + $0x18] sm:$0xf] %vm170_vm2, %v2883_v45  ;;  %2711 = vmatprep.subr.msk.bf16.mxu1 %vm418_vm1, %v3197_v39  ;;  %v3326_v37 = vpack.c.bf16 %v3223_v49, %v3213_v47 }
   0xd   :  { %175 = vst.msk [vmem:[#allocation2 + $0x34] sm:$0xf] %vm170_vm2, %v2887_v46  ;;  %v192_v58 = vld [vmem:[%s4928_s0 + $0x20] sm:$0xff]  ;;  %v48_v60 = vld [vmem:[%s4927_s1 + $0x108] sm:$0xff]  ;;  %v2891_v61 = vpack.c.bf16 %v35_v53, %v35_v53  ;;  %v2895_v62 = vpack.c.bf16 %v42_v54, %v42_v54  ;;  %v49_v0 = vld [vmem:[%s4927_s1 + $0x110] sm:$0xff]  ;;  %v3314_v36 = vpack.c.bf16 %v41_v52, %v3218_v48 }
   0xe   :  { %v3255_v59 = vld [vmem:[%s4927_s1 + $0x100] sm:$0xff]  ;;  %267 = vst.msk [vmem:[#allocation3 + $0x8] sm:$0xf] %vm264_vm0, %v2902_v50  ;;  %268 = vst.msk [vmem:[#allocation3 + $0xc] sm:$0xf] %vm264_vm0, %v2903_v51  ;;  %v2904_v63 = vpack.c.bf16 %v192_v58, %v192_v58  ;;  %v193_v1 = vld [vmem:[%s4928_s0 + $0x28] sm:$0xff]  ;;  %v2899_v4 = vpack.c.bf16 %v49_v0, %v49_v0  ;;  %445 = vmatpush1.bf16.msra.mxu0 %v3240_v55  ;;  %v3330_v40 = vpack.c.bf16 %v48_v60, %v48_v60 }
   0xf   :  { %v194_v2 = vld [vmem:[%s4928_s0 + $0x30] sm:$0xff]  ;;  %v2905_v5 = vpack.c.bf16 %v193_v1, %v193_v1  ;;  %v195_v7 = vld [vmem:[%s4928_s0 + $0x38] sm:$0xff]  ;;  %v196_v8 = vld [vmem:[%s4928_s0 + $0x40] sm:$0xff]  ;;  %179 = vst.msk [vmem:[#allocation2 + $0x50] sm:$0xf] %vm170_vm2, %v2891_v61  ;;  %506 = vmatpush1.bf16.msra.mxu1 %v3243_v56  ;;  %562 = vmatprep.subr.bf16.mxu0 %v3245_v57  ;;  %v3061_v42 = vpack.c.bf16 %v3255_v59, %v3255_v59 }
  0x10   :  { %v2906_v6 = vpack.c.bf16 %v194_v2, %v194_v2  ;;  %v197_v9 = vld [vmem:[%s4928_s0 + $0x48] sm:$0xff]  ;;  %183 = vst.msk [vmem:[#allocation2 + $0x6c] sm:$0xf] %vm170_vm2, %v2895_v62  ;;  %v2907_v10 = vpack.c.bf16 %v195_v7, %v195_v7  ;;  %v2908_v11 = vpack.c.bf16 %v196_v8, %v196_v8  ;;  %v198_v12 = vld [vmem:[%s4928_s0 + $0x50] sm:$0xff]  ;;  %v199_v15 = vld [vmem:[%s4928_s0 + $0x58] sm:$0xff]  ;;  %2933 = vmatprep.subr.bf16.mxu1 %v3063_v24 }
  0x11   :  { %269 = vst.msk [vmem:[#allocation3 + $0x10] sm:$0xf] %vm264_vm0, %v2904_v63  ;;  %v200_v16 = vld [vmem:[%s4928_s0 + $0x60] sm:$0xff]  ;;  %270 = vst.msk [vmem:[#allocation3 + $0x14] sm:$0xf] %vm264_vm0, %v2905_v5  ;;  %v2909_v20 = vpack.c.bf16 %v197_v9, %v197_v9  ;;  %v201_v21 = vld [vmem:[%s4928_s0 + $0x68] sm:$0xff]  ;;  %v2910_v25 = vpack.c.bf16 %v198_v12, %v198_v12  ;;  %v2911_v26 = vpack.c.bf16 %v199_v15, %v199_v15 }
  0x12   :  { %187 = vst.msk [vmem:[#allocation2 + $0x88] sm:$0xf] %vm170_vm2, %v2899_v4  ;;  %v202_v22 = vld [vmem:[%s4928_s0 + $0x70] sm:$0xff]  ;;  %v2912_v28 = vpack.c.bf16 %v200_v16, %v200_v16  ;;  %v2913_v29 = vpack.c.bf16 %v201_v21, %v201_v21  ;;  %v3341_v44 = vsel %vm418_vm1, %v3061_v42, 0 }
  0x13   :  { %271 = vst.msk [vmem:[#allocation3 + $0x18] sm:$0xf] %vm264_vm0, %v2906_v6  ;;  %272 = vst.msk [vmem:[#allocation3 + $0x1c] sm:$0xf] %vm264_vm0, %v2907_v10  ;;  %v2996_v30 = vld [vmem:[#allocation3] sm:$0xff]   ;;  %v2914_v31 = vpack.c.bf16 %v202_v22, %v202_v22 }
  0x14   :  { %273 = vst.msk [vmem:[#allocation3 + $0x20] sm:$0xf] %vm264_vm0, %v2908_v11  ;;  %274 = vst.msk [vmem:[#allocation3 + $0x24] sm:$0xf] %vm264_vm0, %v2909_v20  ;;  %v2997_v35 = vld [vmem:[#allocation2 + $0x18] ss:$28 sps:$4 sm:$0xff]   ;;  %2708 = vmatmul.mubr.msk.bf16.vlgmr.msra.gmra.mrb[0].mxu0 %vm408_vm3, %v2996_v30  ;;  %2712 = vmatmul.mubr.msk.bf16.vlgmr.msra.gmra.mrb[0].mxu1 %vm408_vm3, %v2996_v30 }
  0x15   :  { %275 = vst.msk [vmem:[#allocation3 + $0x28] sm:$0xf] %vm264_vm0, %v2910_v25  ;;  %276 = vst.msk [vmem:[#allocation3 + $0x2c] sm:$0xf] %vm264_vm0, %v2911_v26  ;;  %563 = vmatpush1.bf16.msra.mxu0 %v3297_v17  ;;  %2934 = vmatpush3.bf16.msra.mxu1 %v2997_v35  ;;  %v2998_v41 = vld [vmem:[#allocation3 + $0x8] sm:$0xff]  }
  0x16   :  { %277 = vst.msk [vmem:[#allocation3 + $0x30] sm:$0xf] %vm264_vm0, %v2912_v28  ;;  %278 = vst.msk [vmem:[#allocation3 + $0x34] sm:$0xf] %vm264_vm0, %v2913_v29  ;;  %482 = vmatprep.mubr.bf16.mxu0 %v3062_v3  ;;  %543 = vmatprep.mubr.bf16.mxu1 %v3062_v3  ;;  %v3003_v48 = vld [vmem:[#allocation2 + $0x18] ss:$28 sps:$4 sm:$0xff]  }
  0x17   :  { %279 = vst.msk [vmem:[#allocation3 + $0x38] sm:$0xf] %vm264_vm0, %v2914_v31  ;;  %v2999_v38 = vld [vmem:[#allocation2 + $0x50] ss:$28 sps:$4 sm:$0xff]   ;;  %564 = vmatprep.subr.bf16.mxu0 %v3314_v36  ;;  %2935 = vmatprep.subr.bf16.mxu1 %v3063_v24 }
  0x18   :  { %v3000_v46 = vld [vmem:[#allocation3 + $0x10] ss:$0 sps:$4 sm:$0xff]   ;;  %v3005_v49 = vld [vmem:[#allocation2 + $0x50] ss:$28 sps:$4 sm:$0xff]  }
  0x19   :  { %v3001_v43 = vld [vmem:[#allocation2 + $0x88] ss:$0 sps:$4 sm:$0xff]   ;;  %565 = vmatpush1.bf16.msra.mxu0 %v3326_v37  ;;  %2936 = vmatpush3.bf16.msra.mxu1 %v2999_v38 }
  0x1a   :  { %2715 = vmatprep.subr.msk.bf16.mxu0 %vm418_vm1, %v3330_v40  ;;  %2937 = vmatprep.subr.bf16.mxu1 %v3063_v24  ;;  %v438_v45 = vsel %vm418_vm1, %v3001_v43, 0  ;;  %v3002_v47 = vld [vmem:[#allocation3 + $0x14] sm:$0xff]   ;;  %v3007_v50 = vld [vmem:[#allocation2 + $0x88] ss:$0 sps:$4 sm:$0xff]  }
  0x1b   :  { %v3004_v51 = vld [vmem:[#allocation3 + $0x1c] sm:$0xff]   ;;  %v1225_v52 = vsel %vm418_vm1, %v3007_v50, 0  ;;  %v3006_v53 = vld [vmem:[#allocation3 + $0x24] ss:$0 sps:$4 sm:$0xff]  }
  0x1c   :  { %2709 = vmatmul.mubr.msk.bf16.gmra.mrb[4].mxu0 %vm408_vm3, %v2998_v41  ;;  %2713 = vmatmul.mubr.msk.bf16.gmra.mrb[4].mxu1 %vm408_vm3, %v2998_v41 }
  0x1d   :  { %492 = vmatprep.mubr.bf16.mxu0 %v3062_v3  ;;  %553 = vmatprep.mubr.bf16.mxu1 %v3062_v3 }
  0x1e   :  { %567 = vmatpush1.bf16.msra.mxu0 %v3341_v44  ;;  %2938 = vmatpush3.bf16.msra.mxu1 %v438_v45 }
  0x1f   :  { %1227 = vmatprep.subr.bf16.mxu0 %v3127_v13  ;;  %1288 = vmatprep.subr.bf16.mxu1 %v3140_v18 }
  0x24   :  { %2710 = vmatmul.mubr.msk.bf16.gmra.mrb[8].mxu0 %vm408_vm3, %v3000_v46  ;;  %2714 = vmatmul.mubr.msk.bf16.gmra.mrb[8].mxu1 %vm408_vm3, %v3000_v46 }
  0x25   :  { %594 = vmatprep.mubr.bf16.mxu0 %v3062_v3  ;;  %2939 = vmatprep.mubr.msk.bf16.mxu1 %vm3064_vm4, %v3063_v24 }
  0x2c   :  { %2716 = vmatmul.mubr.msk.bf16.vlgmr.msra.gmra.mrb[12].mxu0 %vm408_vm3, %v2996_v30  ;;  %2940 = vmatmul.mubr.msk.bf16.vlgmr.msra.gmra.mrb[12].mxu1 %vm408_vm3, %v2996_v30 }
  0x2d   :  { %1228 = vmatpush1.bf16.msra.mxu0 %v3129_v14  ;;  %1289 = vmatpush1.bf16.msra.mxu1 %v3142_v19 }
  0x2e   :  { %604 = vmatprep.mubr.bf16.mxu0 %v3062_v3  ;;  %2943 = vmatprep.mubr.msk.bf16.mxu1 %vm3064_vm4, %v3063_v24 }
  0x2f   :  { %1229 = vmatprep.subr.bf16.mxu0 %v3154_v23  ;;  %1290 = vmatprep.subr.bf16.mxu1 %v3182_v32 }
  0x31   :  { %1230 = vmatpush1.bf16.msra.mxu0 %v3167_v27  ;;  %1291 = vmatpush1.bf16.msra.mxu1 %v3184_v33 }
  0x32   :  { %2746 = vmatprep.subr.msk.bf16.mxu0 %vm418_vm1, %v3186_v34  ;;  %2750 = vmatprep.subr.msk.bf16.mxu1 %vm418_vm1, %v3197_v39 }
  0x34   :  { %2717 = vmatmul.mubr.msk.bf16.gmra.mrb[16].mxu0 %vm408_vm3, %v2998_v41  ;;  %2944 = vmatmul.mubr.msk.bf16.gmra.mrb[16].mxu1 %vm408_vm3, %v2998_v41 }
  0x35   :  { %614 = vmatprep.mubr.bf16.mxu0 %v3062_v3  ;;  %2947 = vmatprep.mubr.msk.bf16.mxu1 %vm3064_vm4, %v3063_v24 }
  0x36   :  { %1232 = vmatpush1.bf16.msra.mxu0 %v3240_v55  ;;  %1293 = vmatpush1.bf16.msra.mxu1 %v3243_v56 }
  0x37   :  { %1349 = vmatprep.subr.bf16.mxu0 %v3245_v57  ;;  %2951 = vmatprep.subr.bf16.mxu1 %v3063_v24 }
  0x3c   :  { %2718 = vmatmul.mubr.msk.bf16.gmra.mrb[20].mxu0 %vm408_vm3, %v3000_v46  ;;  %2948 = vmatmul.mubr.msk.bf16.gmra.mrb[20].mxu1 %vm408_vm3, %v3000_v46 }
  0x3d   :  { %1259 = vmatprep.mubr.bf16.mxu0 %v3062_v3  ;;  %1320 = vmatprep.mubr.bf16.mxu1 %v3062_v3 }
  0x44   :  { %2747 = vmatmul.mubr.msk.bf16.vlgmr.msra.gmra.mrb[24].mxu0 %vm408_vm3, %v3002_v47  ;;  %2751 = vmatmul.mubr.msk.bf16.vlgmr.msra.gmra.mrb[24].mxu1 %vm408_vm3, %v3002_v47 }
  0x45   :  { %1350 = vmatpush1.bf16.msra.mxu0 %v3297_v17  ;;  %2952 = vmatpush3.bf16.msra.mxu1 %v3003_v48 }
  0x46   :  { %1269 = vmatprep.mubr.bf16.mxu0 %v3062_v3  ;;  %1330 = vmatprep.mubr.bf16.mxu1 %v3062_v3 }
  0x47   :  { %1351 = vmatprep.subr.bf16.mxu0 %v3314_v36  ;;  %2953 = vmatprep.subr.bf16.mxu1 %v3063_v24 }
  0x49   :  { %1352 = vmatpush1.bf16.msra.mxu0 %v3326_v37  ;;  %2954 = vmatpush3.bf16.msra.mxu1 %v3005_v49 }
  0x4a   :  { %2754 = vmatprep.subr.msk.bf16.mxu0 %vm418_vm1, %v3330_v40  ;;  %2955 = vmatprep.subr.bf16.mxu1 %v3063_v24 }
  0x4c   :  { %2748 = vmatmul.mubr.msk.bf16.gmra.mrb[28].mxu0 %vm408_vm3, %v3004_v51  ;;  %2752 = vmatmul.mubr.msk.bf16.gmra.mrb[28].mxu1 %vm408_vm3, %v3004_v51 }
  0x4d   :  { %1279 = vmatprep.mubr.bf16.mxu0 %v3062_v3  ;;  %1340 = vmatprep.mubr.bf16.mxu1 %v3062_v3 }
  0x4e   :  { %1354 = vmatpush1.bf16.msra.mxu0 %v3341_v44  ;;  %2956 = vmatpush3.bf16.msra.mxu1 %v1225_v52 }
  0x4f   :  { %2014 = vmatprep.subr.bf16.mxu0 %v3127_v13  ;;  %2075 = vmatprep.subr.bf16.mxu1 %v3140_v18  ;;  %v3008_v13 = vld [vmem:[#allocation3 + $0x28] sm:$0xff]   ;;  %v3011_v18 = vld [vmem:[#allocation2 + $0x50] ss:$28 sps:$4 sm:$0xff]  }
  0x54   :  { %2749 = vmatmul.mubr.msk.bf16.gmra.mrb[32].mxu0 %vm408_vm3, %v3006_v53  ;;  %2753 = vmatmul.mubr.msk.bf16.gmra.mrb[32].mxu1 %vm408_vm3, %v3006_v53 }
  0x55   :  { %1381 = vmatprep.mubr.bf16.mxu0 %v3062_v3  ;;  %2957 = vmatprep.mubr.msk.bf16.mxu1 %vm3064_vm4, %v3063_v24 }
  0x5c   :  { %2755 = vmatmul.mubr.msk.bf16.vlgmr.msra.gmra.mrb[36].mxu0 %vm408_vm3, %v3002_v47  ;;  %2958 = vmatmul.mubr.msk.bf16.vlgmr.msra.gmra.mrb[36].mxu1 %vm408_vm3, %v3002_v47 }
  0x5d   :  { %2015 = vmatpush1.bf16.msra.mxu0 %v3129_v14  ;;  %2076 = vmatpush1.bf16.msra.mxu1 %v3142_v19  ;;  %v3009_v14 = vld [vmem:[#allocation2 + $0x18] ss:$28 sps:$4 sm:$0xff]   ;;  %v3013_v19 = vld [vmem:[#allocation2 + $0x88] ss:$0 sps:$4 sm:$0xff]  }
  0x5e   :  { %1391 = vmatprep.mubr.bf16.mxu0 %v3062_v3  ;;  %2961 = vmatprep.mubr.msk.bf16.mxu1 %vm3064_vm4, %v3063_v24 }
  0x5f   :  { %2016 = vmatprep.subr.bf16.mxu0 %v3154_v23  ;;  %2077 = vmatprep.subr.bf16.mxu1 %v3182_v32  ;;  %v3010_v23 = vld [vmem:[#allocation3 + $0x30] sm:$0xff]   ;;  %v3012_v32 = vld [vmem:[#allocation3 + $0x38] ss:$0 sps:$4 sm:$0xff]  }
  0x61   :  { %2017 = vmatpush1.bf16.msra.mxu0 %v3167_v27  ;;  %2078 = vmatpush1.bf16.msra.mxu1 %v3184_v33  ;;  %v2012_v27 = vsel %vm418_vm1, %v3013_v19, 0 }
  0x62   :  { %2825 = vmatprep.subr.msk.bf16.mxu0 %vm418_vm1, %v3186_v34  ;;  %2829 = vmatprep.subr.msk.bf16.mxu1 %vm418_vm1, %v3197_v39 }
  0x64   :  { %2756 = vmatmul.mubr.msk.bf16.gmra.mrb[40].mxu0 %vm408_vm3, %v3004_v51  ;;  %2962 = vmatmul.mubr.msk.bf16.gmra.mrb[40].mxu1 %vm408_vm3, %v3004_v51 }
  0x65   :  { %1401 = vmatprep.mubr.bf16.mxu0 %v3062_v3  ;;  %2965 = vmatprep.mubr.msk.bf16.mxu1 %vm3064_vm4, %v3063_v24 }
  0x66   :  { %2019 = vmatpush1.bf16.msra.mxu0 %v3240_v55  ;;  %2080 = vmatpush1.bf16.msra.mxu1 %v3243_v56 }
  0x67   :  { %2136 = vmatprep.subr.bf16.mxu0 %v3245_v57  ;;  %2969 = vmatprep.subr.bf16.mxu1 %v3063_v24 }
  0x6c   :  { %2757 = vmatmul.mubr.msk.bf16.gmra.mrb[44].mxu0 %vm408_vm3, %v3006_v53  ;;  %2966 = vmatmul.mubr.msk.bf16.gmra.mrb[44].mxu1 %vm408_vm3, %v3006_v53 }
  0x6d   :  { %2046 = vmatprep.mubr.bf16.mxu0 %v3062_v3  ;;  %2107 = vmatprep.mubr.bf16.mxu1 %v3062_v3 }
  0x74   :  { %2826 = vmatmul.mubr.msk.bf16.vlgmr.msra.gmra.mrb[48].mxu0 %vm408_vm3, %v3008_v13  ;;  %2830 = vmatmul.mubr.msk.bf16.vlgmr.msra.gmra.mrb[48].mxu1 %vm408_vm3, %v3008_v13 }
  0x75   :  { %2137 = vmatpush1.bf16.msra.mxu0 %v3297_v17  ;;  %2970 = vmatpush3.bf16.msra.mxu1 %v3009_v14 }
  0x76   :  { %2056 = vmatprep.mubr.bf16.mxu0 %v3062_v3  ;;  %2117 = vmatprep.mubr.bf16.mxu1 %v3062_v3 }
  0x77   :  { %2138 = vmatprep.subr.bf16.mxu0 %v3314_v36  ;;  %2971 = vmatprep.subr.bf16.mxu1 %v3063_v24 }
  0x79   :  { %2139 = vmatpush1.bf16.msra.mxu0 %v3326_v37  ;;  %2972 = vmatpush3.bf16.msra.mxu1 %v3011_v18 }
  0x7a   :  { %2833 = vmatprep.subr.msk.bf16.mxu0 %vm418_vm1, %v3330_v40  ;;  %2973 = vmatprep.subr.bf16.mxu1 %v3063_v24 }
  0x7c   :  { %2827 = vmatmul.mubr.msk.bf16.gmra.mrb[52].mxu0 %vm408_vm3, %v3010_v23  ;;  %2831 = vmatmul.mubr.msk.bf16.gmra.mrb[52].mxu1 %vm408_vm3, %v3010_v23 }
  0x7d   :  { %2066 = vmatprep.mubr.bf16.mxu0 %v3062_v3  ;;  %2127 = vmatprep.mubr.bf16.mxu1 %v3062_v3 }
  0x7e   :  { %2141 = vmatpush1.bf16.msra.mxu0 %v3341_v44  ;;  %2974 = vmatpush3.bf16.msra.mxu1 %v2012_v27 }
  0x84   :  { %2828 = vmatmul.mubr.msk.bf16.gmra.mrb[56].mxu0 %vm408_vm3, %v3012_v32  ;;  %2832 = vmatmul.mubr.msk.bf16.gmra.mrb[56].mxu1 %vm408_vm3, %v3012_v32 }
  0x85   :  { %2168 = vmatprep.mubr.bf16.mxu0 %v3062_v3  ;;  %2975 = vmatprep.mubr.msk.bf16.mxu1 %vm3064_vm4, %v3063_v24 }
  0x8c   :  { %2834 = vmatmul.mubr.msk.bf16.vlgmr.msra.gmra.mrb[60].mxu0 %vm408_vm3, %v3008_v13  ;;  %2976 = vmatmul.mubr.msk.bf16.vlgmr.msra.gmra.mrb[60].mxu1 %vm408_vm3, %v3008_v13 }
  0x8d   :  { %2178 = vmatprep.mubr.bf16.mxu0 %v3062_v3  ;;  %2979 = vmatprep.mubr.msk.bf16.mxu1 %vm3064_vm4, %v3063_v24 }
  0x94   :  { %2835 = vmatmul.mubr.msk.bf16.gmra.mrb[64].mxu0 %vm408_vm3, %v3010_v23  ;;  %2980 = vmatmul.mubr.msk.bf16.gmra.mrb[64].mxu1 %vm408_vm3, %v3010_v23 }
  0x95   :  { %2188 = vmatprep.mubr.bf16.mxu0 %v3062_v3  ;;  %2983 = vmatprep.mubr.msk.bf16.mxu1 %vm3064_vm4, %v3063_v24 }
  0x9c   :  { %2836 = vmatmul.mubr.msk.bf16.gmra.mrb[68].mxu0 %vm408_vm3, %v3012_v32  ;;  %2984 = vmatmul.mubr.msk.bf16.gmra.mrb[68].mxu1 %vm408_vm3, %v3012_v32 }
  0xe7   :  { %v3470_v33 = vpop.f32.mrb[0].mxu0  ;;  %v3472_v34 = vpop.f32.mrb[0].mxu1 }
  0xe8   :  { %v725_v39 = vmul.f32 %v3470_v33, %v3470_v33  ;;  %v3476_v54 = vpop.f32.mrb[1].mxu0  ;;  %v3478_v55 = vpop.f32.mrb[1].mxu1  ;;  %v727_v57 = vmul.f32 %v3472_v34, %v3472_v34 }
  0xe9   :  { %v679_v3 = vadd.f32 %v3476_v54, %v3470_v33  ;;  %v726_v56 = vmul.f32 %v3476_v54, %v3476_v54  ;;  %v3486_v58 = vpop.f32.mrb[2].mxu0  ;;  %v3488_v59 = vpop.f32.mrb[2].mxu1  ;;  %v728_v4 = vmul.f32 %v3478_v55, %v3478_v55 }
  0xea   :  { %v732_v60 = vmul.f32 %v3486_v58, %v3486_v58  ;;  %v3492_v61 = vpop.f32.mrb[3].mxu0  ;;  %v3494_v62 = vpop.f32.mrb[3].mxu1  ;;  %v734_v5 = vmul.f32 %v3488_v59, %v3488_v59 }
  0xeb   :  { %v760_v63 = vadd.f32 %v726_v56, %v725_v39  ;;  %v680_v0 = vadd.f32 %v679_v3, %v3472_v34  ;;  %v689_v1 = vadd.f32 %v3492_v61, %v3486_v58  ;;  %v733_v2 = vmul.f32 %v3492_v61, %v3492_v61 }
  0xec   :  { %v735_v15 = vmul.f32 %v3494_v62, %v3494_v62 }
  0xed   :  { %v761_v6 = vadd.f32 %v760_v63, %v727_v57  ;;  %v681_v7 = vadd.f32 %v680_v0, %v3478_v55  ;;  %v769_v8 = vadd.f32 %v733_v2, %v732_v60  ;;  %v690_v9 = vadd.f32 %v689_v1, %v3488_v59 }
  0xef   :  { %v3507_v10 = vadd.f32 %v761_v6, %v728_v4  ;;  %v770_v11 = vadd.f32 %v769_v8, %v734_v5  ;;  %v691_v12 = vadd.f32 %v690_v9, %v3494_v62  ;;  %v3512_v16 = vpop.f32.mrb[4].mxu0  ;;  %v3514_v17 = vpop.f32.mrb[4].mxu1 }
  0xf0   :  { %v739_v20 = vmul.f32 %v3512_v16, %v3512_v16  ;;  %v3518_v21 = vpop.f32.mrb[5].mxu0  ;;  %v3520_v22 = vpop.f32.mrb[5].mxu1  ;;  %v741_v28 = vmul.f32 %v3514_v17, %v3514_v17 }
  0xf1   :  { %v3522_v24 = vadd.f32 %v770_v11, %v735_v15  ;;  %v698_v25 = vadd.f32 %v3518_v21, %v3512_v16  ;;  %v740_v26 = vmul.f32 %v3518_v21, %v3518_v21  ;;  %v3530_v29 = vpop.f32.mrb[6].mxu0  ;;  %v3532_v30 = vpop.f32.mrb[6].mxu1  ;;  %v742_v42 = vmul.f32 %v3520_v22, %v3520_v22 }
  0xf2   :  { %v746_v31 = vmul.f32 %v3530_v29, %v3530_v29  ;;  %v3536_v35 = vpop.f32.mrb[7].mxu0  ;;  %v3538_v36 = vpop.f32.mrb[7].mxu1  ;;  %v748_v43 = vmul.f32 %v3532_v30, %v3532_v30 }
  0xf3   :  { %v778_v37 = vadd.f32 %v740_v26, %v739_v20  ;;  %v699_v38 = vadd.f32 %v698_v25, %v3514_v17  ;;  %v707_v40 = vadd.f32 %v3536_v35, %v3530_v29  ;;  %v747_v41 = vmul.f32 %v3536_v35, %v3536_v35 }
  0xf4   :  { %v749_v51 = vmul.f32 %v3538_v36, %v3538_v36 }
  0xf5   :  { %v779_v44 = vadd.f32 %v778_v37, %v741_v28  ;;  %v700_v45 = vadd.f32 %v699_v38, %v3520_v22  ;;  %v787_v46 = vadd.f32 %v747_v41, %v746_v31  ;;  %v708_v47 = vadd.f32 %v707_v40, %v3532_v30 }
  0xf7   :  { %v3551_v48 = vadd.f32 %v779_v44, %v742_v42  ;;  %v788_v49 = vadd.f32 %v787_v46, %v748_v43  ;;  %v3554_v50 = vadd.f32 %v708_v47, %v3538_v36  ;;  %v3558_v52 = vpop.f32.mrb[8].mxu0  ;;  %v3560_v53 = vpop.f32.mrb[8].mxu1 }
  0xf8   :  { %5011 = vst [vmem:[#allocation4_spill] sm:$0xff] %v3560_v53  ;;  %v753_v13 = vmul.f32 %v3558_v52, %v3558_v52  ;;  %v3564_v14 = vpop.f32.mrb[9].mxu0  ;;  %v3566_v18 = vpop.f32.mrb[9].mxu1  ;;  %v755_v32 = vmul.f32 %v3560_v53, %v3560_v53 }
  0xf9   :  { %5012 = vst [vmem:[#allocation5_spill] sm:$0xff] %v3566_v18  ;;  %v3568_v19 = vadd.f32 %v788_v49, %v749_v51  ;;  %v716_v23 = vadd.f32 %v3564_v14, %v3558_v52  ;;  %v754_v27 = vmul.f32 %v3564_v14, %v3564_v14  ;;  %v498_v39 = vpop.f32.mrb[10].mxu0  ;;  %v559_v3 = vpop.f32.mrb[10].mxu1  ;;  %v756_v2 = vmul.f32 %v3566_v18, %v3566_v18 }
  0xfa   :  { %v499_v56 = vpop.f32.mrb[11].mxu0  ;;  %v560_v57 = vpop.f32.mrb[11].mxu1 }
  0xfb   :  { %v796_v60 = vadd.f32 %v754_v27, %v753_v13  ;;  %v717_v63 = vadd.f32 %v716_v23, %v3560_v53 }
  0xfd   :  { %v797_v0 = vadd.f32 %v796_v60, %v755_v32  ;;  %v3578_v1 = vadd.f32 %v717_v63, %v3566_v18 }
  0xff   :  { %v3582_v4 = vadd.f32 %v797_v0, %v756_v2  ;;  %v3584_v5 = vpop.f32.mrb[12].mxu0  ;;  %v3586_v6 = vpop.f32.mrb[12].mxu1 }
 0x100   :  { %v682_v8 = vadd.f32 %v681_v7, %v3584_v5  ;;  %v729_v9 = vmul.f32 %v3584_v5, %v3584_v5  ;;  %v3591_v11 = vpop.f32.mrb[13].mxu0  ;;  %v2941_v15 = vpop.f32.mrb[13].mxu1  ;;  %v731_v20 = vmul.f32 %v3586_v6, %v3586_v6  ;;  %v685_v31 = vsel %vm684_vm5, %v3586_v6, 0.0 }
 0x101   :  { %v730_v25 = vmul.f32 %v3591_v11, %v3591_v11  ;;  %v3597_v26 = vpop.f32.mrb[14].mxu0  ;;  %v3599_v28 = vpop.f32.mrb[14].mxu1 }
 0x102   :  { %v692_v7 = vadd.f32 %v691_v12, %v3597_v26  ;;  %v736_v37 = vmul.f32 %v3597_v26, %v3597_v26  ;;  %v3606_v38 = vpop.f32.mrb[15].mxu0  ;;  %v2942_v40 = vpop.f32.mrb[15].mxu1  ;;  %v683_v41 = vadd.f32 %v682_v8, %v3591_v11  ;;  %v738_v43 = vmul.f32 %v3599_v28, %v3599_v28 }
 0x103   :  { %v737_v42 = vmul.f32 %v3606_v38, %v3606_v38  ;;  %v763_v44 = vadd.f32 %v3507_v10, %v729_v9  ;;  %v765_v47 = vsel %vm684_vm5, %v731_v20, 0.0  ;;  %v694_v13 = vsel %vm684_vm5, %v3599_v28, 0.0 }
 0x104   :  { %v686_v46 = vadd.f32 %v685_v31, %v683_v41  ;;  %v693_v12 = vadd.f32 %v692_v7, %v3606_v38  ;;  %v772_v49 = vadd.f32 %v3522_v24, %v736_v37  ;;  %v774_v10 = vsel %vm684_vm5, %v738_v43, 0.0 }
 0x105   :  { %v764_v51 = vadd.f32 %v763_v44, %v730_v25 }
 0x106   :  { %687 = vadd.xlane.f32.xlu0 %v686_v46  ;;  %v695_v23 = vadd.f32 %v694_v13, %v693_v12  ;;  %v773_v27 = vadd.f32 %v772_v49, %v737_v42 }
 0x107   :  { %v3619_v32 = vpop.f32.mrb[16].mxu0  ;;  %v3621_v39 = vpop.f32.mrb[16].mxu1  ;;  %v766_v3 = vadd.f32 %v765_v47, %v764_v51 }
 0x108   :  { %v701_v56 = vadd.f32 %v700_v45, %v3619_v32  ;;  %v743_v57 = vmul.f32 %v3619_v32, %v3619_v32  ;;  %v745_v24 = vmul.f32 %v3621_v39, %v3621_v39  ;;  %v3629_v60 = vpop.f32.mrb[17].mxu0  ;;  %v2945_v63 = vpop.f32.mrb[17].mxu1  ;;  %v775_v0 = vadd.f32 %v774_v10, %v773_v27 }
 0x109   :  { %767 = vadd.xlane.f32.xlu1 %v766_v3  ;;  %v744_v2 = vmul.f32 %v3629_v60, %v3629_v60  ;;  %v3633_v8 = vpop.f32.mrb[18].mxu0  ;;  %v3635_v9 = vpop.f32.mrb[18].mxu1  ;;  %v703_v45 = vsel %vm684_vm5, %v3621_v39, 0.0 }
 0x10a   :  { %v710_v15 = vadd.f32 %v3554_v50, %v3633_v8  ;;  %v750_v20 = vmul.f32 %v3633_v8, %v3633_v8  ;;  %696 = vadd.xlane.f32.xlu0 %v695_v23  ;;  %v3643_v25 = vpop.f32.mrb[19].mxu0  ;;  %v2946_v31 = vpop.f32.mrb[19].mxu1  ;;  %v702_v7 = vadd.f32 %v701_v56, %v3629_v60  ;;  %v752_v37 = vmul.f32 %v3635_v9, %v3635_v9 }
 0x10b   :  { %v751_v40 = vmul.f32 %v3643_v25, %v3643_v25  ;;  %v781_v41 = vadd.f32 %v3551_v48, %v743_v57  ;;  %v783_v44 = vsel %vm684_vm5, %v745_v24, 0.0  ;;  %v712_v46 = vsel %vm684_vm5, %v3635_v9, 0.0 }
 0x10c   :  { %v704_v42 = vadd.f32 %v703_v45, %v702_v7  ;;  %v790_v50 = vadd.f32 %v3568_v19, %v750_v20  ;;  %v711_v43 = vadd.f32 %v710_v15, %v3643_v25  ;;  %v792_v48 = vsel %vm684_vm5, %v752_v37, 0.0 }
 0x10d   :  { %v782_v47 = vadd.f32 %v781_v41, %v744_v2 }
 0x10e   :  { %776 = vadd.xlane.f32.xlu0 %v775_v0  ;;  %705 = vadd.xlane.f32.xlu1 %v704_v42  ;;  %v791_v12 = vadd.f32 %v790_v50, %v751_v40  ;;  %v713_v49 = vadd.f32 %v712_v46, %v711_v43 }
 0x10f   :  { %v3656_v51 = vpop.f32.mrb[20].mxu0  ;;  %v3658_v13 = vpop.f32.mrb[20].mxu1  ;;  %v784_v23 = vadd.f32 %v783_v44, %v782_v47 }
 0x110   :  { %5013 = vst [vmem:[#allocation6_spill] sm:$0xff] %v3656_v51  ;;  %5014 = vst [vmem:[#allocation7_spill] sm:$0xff] %v3658_v13  ;;  %v719_v19 = vadd.f32 %v3578_v1, %v3656_v51  ;;  %v757_v27 = vmul.f32 %v3656_v51, %v3656_v51  ;;  %v3665_v3 = vpop.f32.mrb[21].mxu0  ;;  %v759_v10 = vmul.f32 %v3658_v13, %v3658_v13  ;;  %v2949_v56 = vpop.f32.mrb[21].mxu1  ;;  %v721_v2 = vsel %vm684_vm5, %v3658_v13, 0.0 }
 0x111   :  { %5015 = vst [vmem:[#allocation8_spill] sm:$0xff] %v3665_v3  ;;  %v793_v57 = vadd.f32 %v792_v48, %v791_v12  ;;  %v758_v24 = vmul.f32 %v3665_v3, %v3665_v3  ;;  %v620_v63 = vpop.f32.mrb[22].mxu0  ;;  %v676_v0 = vpop.f32.mrb[22].mxu1 }
 0x112   :  { %714 = vadd.xlane.f32.xlu1 %v713_v49  ;;  %v621_v1 = vpop.f32.mrb[23].mxu0  ;;  %v2950_v45 = vpop.f32.mrb[23].mxu1  ;;  %v720_v15 = vadd.f32 %v719_v19, %v3665_v3  ;;  %v799_v20 = vadd.f32 %v3582_v4, %v757_v27  ;;  %v801_v31 = vsel %vm684_vm5, %v759_v10, 0.0 }
 0x113   :  { %794 = vadd.xlane.f32.xlu0 %v793_v57 }
 0x114   :  { %v722_v7 = vadd.f32 %v721_v2, %v720_v15  ;;  %v800_v37 = vadd.f32 %v799_v20, %v758_v24 }
 0x116   :  { %785 = vadd.xlane.f32.xlu1 %v784_v23  ;;  %v802_v40 = vadd.f32 %v801_v31, %v800_v37 }
 0x117   :  { %723 = vadd.xlane.f32.xlu0 %v722_v7  ;;  %v3676_v41 = vpop.f32.mrb[24].mxu0  ;;  %v3678_v42 = vpop.f32.mrb[24].mxu1 }
 0x118   :  { %5016 = vst [vmem:[#allocation9_spill] sm:$0xff] %v3676_v41  ;;  %5017 = vst [vmem:[#allocation10_spill] sm:$0xff] %v3678_v42  ;;  %v1511_v50 = vmul.f32 %v3676_v41, %v3676_v41  ;;  %v3682_v43 = vpop.f32.mrb[25].mxu0  ;;  %v3684_v44 = vpop.f32.mrb[25].mxu1  ;;  %v1513_v47 = vmul.f32 %v3678_v42, %v3678_v42 }
 0x119   :  { %5018 = vst [vmem:[#allocation11_spill] sm:$0xff] %v3682_v43  ;;  %5019 = vst [vmem:[#allocation12_spill] sm:$0xff] %v3684_v44  ;;  %v1466_v4 = vadd.f32 %v3682_v43, %v3676_v41  ;;  %v1512_v46 = vmul.f32 %v3682_v43, %v3682_v43  ;;  %v3692_v12 = vpop.f32.mrb[26].mxu0  ;;  %v3694_v49 = vpop.f32.mrb[26].mxu1  ;;  %v1514_v24 = vmul.f32 %v3684_v44, %v3684_v44 }
 0x11a   :  { %5020 = vst [vmem:[#allocation13_spill] sm:$0xff] %v3692_v12  ;;  %5021 = vst [vmem:[#allocation14_spill] sm:$0xff] %v3694_v49  ;;  %v1518_v48 = vmul.f32 %v3692_v12, %v3692_v12  ;;  %803 = vadd.xlane.f32.xlu1 %v802_v40  ;;  %v3698_v23 = vpop.f32.mrb[27].mxu0  ;;  %v3700_v19 = vpop.f32.mrb[27].mxu1  ;;  %v1520_v63 = vmul.f32 %v3694_v49, %v3694_v49 }
 0x11b   :  { %5022 = vst [vmem:[#allocation15_spill] sm:$0xff] %v3698_v23  ;;  %5023 = vst [vmem:[#allocation16_spill] sm:$0xff] %v3700_v19  ;;  %v1546_v27 = vadd.f32 %v1512_v46, %v1511_v50  ;;  %v1467_v10 = vadd.f32 %v1466_v4, %v3678_v42  ;;  %v1475_v56 = vadd.f32 %v3698_v23, %v3692_v12 }
 0x11c   :  { %v1519_v57 = vmul.f32 %v3698_v23, %v3698_v23  ;;  %v1521_v31 = vmul.f32 %v3700_v19, %v3700_v19 }
 0x11d   :  { %v1547_v0 = vadd.f32 %v1546_v27, %v1513_v47  ;;  %v1468_v2 = vadd.f32 %v1467_v10, %v3684_v44  ;;  %v1476_v45 = vadd.f32 %v1475_v56, %v3694_v49 }
 0x11e   :  { %v1555_v1 = vadd.f32 %v1519_v57, %v1518_v48 }
 0x11f   :  { %v3713_v15 = vadd.f32 %v1547_v0, %v1514_v24  ;;  %v1477_v20 = vadd.f32 %v1476_v45, %v3700_v19  ;;  %v3718_v37 = vpop.f32.mrb[28].mxu0  ;;  %v3720_v40 = vpop.f32.mrb[28].mxu1 }
 0x120   :  { %v1556_v7 = vadd.f32 %v1555_v1, %v1520_v63  ;;  %5024 = vst [vmem:[#allocation17_spill] sm:$0xff] %v3718_v37  ;;  %5025 = vst [vmem:[#allocation18_spill] sm:$0xff] %v3720_v40  ;;  %v1525_v50 = vmul.f32 %v3718_v37, %v3718_v37  ;;  %v3724_v4 = vpop.f32.mrb[29].mxu0  ;;  %v3726_v46 = vpop.f32.mrb[29].mxu1  ;;  %v1527_v10 = vmul.f32 %v3720_v40, %v3720_v40 }
 0x121   :  { %5026 = vst [vmem:[#allocation19_spill] sm:$0xff] %v3724_v4  ;;  %5027 = vst [vmem:[#allocation20_spill] sm:$0xff] %v3726_v46  ;;  %v1484_v48 = vadd.f32 %v3724_v4, %v3718_v37  ;;  %v1526_v27 = vmul.f32 %v3724_v4, %v3724_v4  ;;  %v3736_v56 = vpop.f32.mrb[30].mxu0  ;;  %v3738_v57 = vpop.f32.mrb[30].mxu1  ;;  %v1528_v19 = vmul.f32 %v3726_v46, %v3726_v46 }
 0x122   :  { %v3728_v47 = vadd.f32 %v1556_v7, %v1521_v31  ;;  %5028 = vst [vmem:[#allocation21_spill] sm:$0xff] %v3736_v56  ;;  %5029 = vst [vmem:[#allocation22_spill] sm:$0xff] %v3738_v57  ;;  %v1532_v24 = vmul.f32 %v3736_v56, %v3736_v56  ;;  %v3742_v63 = vpop.f32.mrb[31].mxu0  ;;  %v3744_v0 = vpop.f32.mrb[31].mxu1  ;;  %v1534_v49 = vmul.f32 %v3738_v57, %v3738_v57 }
 0x123   :  { %5030 = vst [vmem:[#allocation23_spill] sm:$0xff] %v3742_v63  ;;  %5031 = vst [vmem:[#allocation24_spill] sm:$0xff] %v3744_v0  ;;  %v1564_v1 = vadd.f32 %v1526_v27, %v1525_v50  ;;  %v1485_v45 = vadd.f32 %v1484_v48, %v3720_v40  ;;  %v1493_v31 = vadd.f32 %v3742_v63, %v3736_v56 }
 0x124   :  { %v1533_v7 = vmul.f32 %v3742_v63, %v3742_v63  ;;  %v1535_v63 = vmul.f32 %v3744_v0, %v3744_v0 }
 0x125   :  { %v1565_v23 = vadd.f32 %v1564_v1, %v1527_v10  ;;  %v1486_v12 = vadd.f32 %v1485_v45, %v3726_v46  ;;  %v1494_v50 = vadd.f32 %v1493_v31, %v3738_v57 }
 0x126   :  { %v1573_v4 = vadd.f32 %v1533_v7, %v1532_v24 }
 0x127   :  { %v3757_v27 = vadd.f32 %v1565_v23, %v1528_v19  ;;  %v3760_v56 = vadd.f32 %v1494_v50, %v3744_v0  ;;  %v3764_v40 = vpop.f32.mrb[32].mxu0  ;;  %v3766_v37 = vpop.f32.mrb[32].mxu1 }
 0x128   :  { %v1574_v48 = vadd.f32 %v1573_v4, %v1534_v49  ;;  %5032 = vst [vmem:[#allocation25_spill] sm:$0xff] %v3764_v40  ;;  %5033 = vst [vmem:[#allocation26_spill] sm:$0xff] %v3766_v37  ;;  %v1539_v10 = vmul.f32 %v3764_v40, %v3764_v40  ;;  %v3770_v1 = vpop.f32.mrb[33].mxu0  ;;  %v3772_v24 = vpop.f32.mrb[33].mxu1  ;;  %v1541_v4 = vmul.f32 %v3766_v37, %v3766_v37 }
 0x129   :  { %5034 = vst [vmem:[#allocation27_spill] sm:$0xff] %v3770_v1  ;;  %5035 = vst [vmem:[#allocation28_spill] sm:$0xff] %v3772_v24  ;;  %v1502_v49 = vadd.f32 %v3770_v1, %v3764_v40  ;;  %v1540_v19 = vmul.f32 %v3770_v1, %v3770_v1  ;;  %v1285_v45 = vpop.f32.mrb[34].mxu0  ;;  %v1346_v31 = vpop.f32.mrb[34].mxu1 }
 0x12a   :  { %v3774_v23 = vadd.f32 %v1574_v48, %v1535_v63  ;;  %v1286_v7 = vpop.f32.mrb[35].mxu0  ;;  %v1347_v50 = vpop.f32.mrb[35].mxu1  ;;  %v1542_v48 = vmul.f32 %v3772_v24, %v3772_v24 }
 0x12b   :  { %v1582_v0 = vadd.f32 %v1540_v19, %v1539_v10  ;;  %v1503_v57 = vadd.f32 %v1502_v49, %v3766_v37 }
 0x12d   :  { %v1583_v46 = vadd.f32 %v1582_v0, %v1541_v4  ;;  %v3784_v63 = vadd.f32 %v1503_v57, %v3772_v24 }
 0x12f   :  { %v3788_v40 = vadd.f32 %v1583_v46, %v1542_v48  ;;  %v3790_v1 = vpop.f32.mrb[36].mxu0  ;;  %v3792_v44 = vpop.f32.mrb[36].mxu1 }
 0x130   :  { %5036 = vst [vmem:[#allocation29_spill] sm:$0xff] %v3790_v1  ;;  %5037 = vst [vmem:[#allocation30_spill] sm:$0xff] %v3792_v44  ;;  %v1469_v45 = vadd.f32 %v1468_v2, %v3790_v1  ;;  %v1515_v10 = vmul.f32 %v3790_v1, %v3790_v1  ;;  %v3797_v19 = vpop.f32.mrb[37].mxu0  ;;  %v1517_v57 = vmul.f32 %v3792_v44, %v3792_v44  ;;  %v2959_v0 = vpop.f32.mrb[37].mxu1  ;;  %v1471_v31 = vsel %vm684_vm5, %v3792_v44, 0.0 }
 0x131   :  { %5038 = vst [vmem:[#allocation31_spill] sm:$0xff] %v3797_v19  ;;  %v1516_v49 = vmul.f32 %v3797_v19, %v3797_v19  ;;  %v3803_v46 = vpop.f32.mrb[38].mxu0  ;;  %v3805_v4 = vpop.f32.mrb[38].mxu1 }
 0x132   :  { %5039 = vst [vmem:[#allocation32_spill] sm:$0xff] %v3803_v46  ;;  %5040 = vst [vmem:[#allocation33_spill] sm:$0xff] %v3805_v4  ;;  %v1478_v2 = vadd.f32 %v1477_v20, %v3803_v46  ;;  %v1522_v7 = vmul.f32 %v3803_v46, %v3803_v46  ;;  %v3812_v50 = vpop.f32.mrb[39].mxu0  ;;  %v2960_v48 = vpop.f32.mrb[39].mxu1  ;;  %v1470_v0 = vadd.f32 %v1469_v45, %v3797_v19  ;;  %v1551_v20 = vsel %vm684_vm5, %v1517_v57, 0.0 }
 0x133   :  { %5041 = vst [vmem:[#allocation34_spill] sm:$0xff] %v3812_v50  ;;  %v1523_v24 = vmul.f32 %v3812_v50, %v3812_v50  ;;  %v1524_v37 = vmul.f32 %v3805_v4, %v3805_v4  ;;  %v1549_v1 = vadd.f32 %v3713_v15, %v1515_v10  ;;  %v1480_v48 = vsel %vm684_vm5, %v3805_v4, 0.0 }
 0x134   :  { %v1472_v42 = vadd.f32 %v1471_v31, %v1470_v0  ;;  %v1479_v44 = vadd.f32 %v1478_v2, %v3812_v50  ;;  %v1558_v46 = vadd.f32 %v3728_v47, %v1522_v7 }
 0x135   :  { %v1550_v43 = vadd.f32 %v1549_v1, %v1516_v49  ;;  %v1560_v15 = vsel %vm684_vm5, %v1524_v37, 0.0 }
 0x136   :  { %1473 = vadd.xlane.f32.xlu0 %v1472_v42  ;;  %v1481_v45 = vadd.f32 %v1480_v48, %v1479_v44  ;;  %v1559_v19 = vadd.f32 %v1558_v46, %v1523_v24 }
 0x137   :  { %v3825_v41 = vpop.f32.mrb[40].mxu0  ;;  %v3827_v13 = vpop.f32.mrb[40].mxu1  ;;  %v1552_v3 = vadd.f32 %v1551_v20, %v1550_v43 }
 0x138   :  { %5042 = vst [vmem:[#allocation35_spill] sm:$0xff] %v3825_v41  ;;  %5043 = vst [vmem:[#allocation36_spill] sm:$0xff] %v3827_v13  ;;  %v1487_v10 = vadd.f32 %v1486_v12, %v3825_v41  ;;  %v1529_v57 = vmul.f32 %v3825_v41, %v3825_v41  ;;  %v1531_v47 = vmul.f32 %v3827_v13, %v3827_v13  ;;  %1482 = vadd.xlane.f32.xlu1 %v1481_v45  ;;  %v3835_v1 = vpop.f32.mrb[41].mxu0  ;;  %v2963_v42 = vpop.f32.mrb[41].mxu1 }
 0x139   :  { %5044 = vst [vmem:[#allocation37_spill] sm:$0xff] %v3835_v1  ;;  %v1561_v44 = vadd.f32 %v1560_v15, %v1559_v19  ;;  %v1530_v24 = vmul.f32 %v3835_v1, %v3835_v1  ;;  %v3839_v49 = vpop.f32.mrb[42].mxu0  ;;  %v3841_v43 = vpop.f32.mrb[42].mxu1  ;;  %v1489_v12 = vsel %vm684_vm5, %v3827_v13, 0.0 }
 0x13a   :  { %5045 = vst [vmem:[#allocation38_spill] sm:$0xff] %v3839_v49  ;;  %5046 = vst [vmem:[#allocation39_spill] sm:$0xff] %v3841_v43  ;;  %v1496_v37 = vadd.f32 %v3760_v56, %v3839_v49  ;;  %v1536_v46 = vmul.f32 %v3839_v49, %v3839_v49  ;;  %1553 = vadd.xlane.f32.xlu0 %v1552_v3  ;;  %v3849_v31 = vpop.f32.mrb[43].mxu0  ;;  %v2964_v19 = vpop.f32.mrb[43].mxu1  ;;  %v1488_v2 = vadd.f32 %v1487_v10, %v3835_v1 }
 0x13b   :  { %5047 = vst [vmem:[#allocation40_spill] sm:$0xff] %v3849_v31  ;;  %v1538_v7 = vmul.f32 %v3841_v43, %v3841_v43  ;;  %v1537_v0 = vmul.f32 %v3849_v31, %v3849_v31  ;;  %v1567_v20 = vadd.f32 %v3757_v27, %v1529_v57  ;;  %v1569_v3 = vsel %vm684_vm5, %v1531_v47, 0.0 }
 0x13c   :  { %1562 = vadd.xlane.f32.xlu1 %v1561_v44  ;;  %v1490_v48 = vadd.f32 %v1489_v12, %v1488_v2  ;;  %v1576_v56 = vadd.f32 %v3774_v23, %v1536_v46  ;;  %v1497_v45 = vadd.f32 %v1496_v37, %v3849_v31  ;;  %v1498_v15 = vsel %vm684_vm5, %v3841_v43, 0.0 }
 0x13d   :  { %v1568_v10 = vadd.f32 %v1567_v20, %v1530_v24  ;;  %v1578_v27 = vsel %vm684_vm5, %v1538_v7, 0.0 }
 0x13e   :  { %1491 = vadd.xlane.f32.xlu0 %v1490_v48  ;;  %v1577_v42 = vadd.f32 %v1576_v56, %v1537_v0  ;;  %v1499_v19 = vadd.f32 %v1498_v15, %v1497_v45 }
 0x13f   :  { %v3862_v13 = vpop.f32.mrb[44].mxu0  ;;  %v3864_v49 = vpop.f32.mrb[44].mxu1  ;;  %v1570_v57 = vadd.f32 %v1569_v3, %v1568_v10 }
 0x140   :  { %5048 = vst [vmem:[#allocation41_spill] sm:$0xff] %v3862_v13  ;;  %5049 = vst [vmem:[#allocation42_spill] sm:$0xff] %v3864_v49  ;;  %v1505_v23 = vadd.f32 %v3784_v63, %v3862_v13  ;;  %v1543_v47 = vmul.f32 %v3862_v13, %v3862_v13  ;;  %v3871_v44 = vpop.f32.mrb[45].mxu0  ;;  %v1545_v24 = vmul.f32 %v3864_v49, %v3864_v49  ;;  %v2967_v12 = vpop.f32.mrb[45].mxu1  ;;  %v1507_v7 = vsel %vm684_vm5, %v3864_v49, 0.0 }
 0x141   :  { %5050 = vst [vmem:[#allocation43_spill] sm:$0xff] %v3871_v44  ;;  %v1579_v37 = vadd.f32 %v1578_v27, %v1577_v42  ;;  %v1544_v46 = vmul.f32 %v3871_v44, %v3871_v44  ;;  %v1407_v2 = vpop.f32.mrb[46].mxu0  ;;  %v1463_v0 = vpop.f32.mrb[46].mxu1 }
 0x142   :  { %1500 = vadd.xlane.f32.xlu0 %v1499_v19  ;;  %v1408_v63 = vpop.f32.mrb[47].mxu0  ;;  %v2968_v20 = vpop.f32.mrb[47].mxu1  ;;  %v1506_v48 = vadd.f32 %v1505_v23, %v3871_v44  ;;  %v1585_v56 = vadd.f32 %v3788_v40, %v1543_v47  ;;  %v1587_v45 = vsel %vm684_vm5, %v1545_v24, 0.0 }
 0x143   :  { %1580 = vadd.xlane.f32.xlu1 %v1579_v37 }
 0x144   :  { %v1508_v3 = vadd.f32 %v1507_v7, %v1506_v48  ;;  %v1586_v15 = vadd.f32 %v1585_v56, %v1544_v46 }
 0x146   :  { %1571 = vadd.xlane.f32.xlu0 %v1570_v57  ;;  %v1588_v10 = vadd.f32 %v1587_v45, %v1586_v15 }
 0x147   :  { %v3882_v42 = vpop.f32.mrb[48].mxu0  ;;  %v3884_v27 = vpop.f32.mrb[48].mxu1 }
 0x148   :  { %5051 = vst [vmem:[#allocation44_spill] sm:$0xff] %v3882_v42  ;;  %5052 = vst [vmem:[#allocation45_spill] sm:$0xff] %v3884_v27  ;;  %v2298_v12 = vmul.f32 %v3882_v42, %v3882_v42  ;;  %v3888_v19 = vpop.f32.mrb[49].mxu0  ;;  %v3890_v37 = vpop.f32.mrb[49].mxu1  ;;  %v2300_v57 = vmul.f32 %v3884_v27, %v3884_v27 }
 0x149   :  { %5053 = vst [vmem:[#allocation46_spill] sm:$0xff] %v3888_v19  ;;  %5054 = vst [vmem:[#allocation47_spill] sm:$0xff] %v3890_v37  ;;  %v2253_v40 = vadd.f32 %v3888_v19, %v3882_v42  ;;  %v2299_v23 = vmul.f32 %v3888_v19, %v3888_v19  ;;  %v3898_v47 = vpop.f32.mrb[50].mxu0  ;;  %v3900_v24 = vpop.f32.mrb[50].mxu1  ;;  %v2301_v56 = vmul.f32 %v3890_v37, %v3890_v37 }
 0x14a   :  { %5055 = vst [vmem:[#allocation48_spill] sm:$0xff] %v3898_v47  ;;  %5056 = vst [vmem:[#allocation49_spill] sm:$0xff] %v3900_v24  ;;  %v2305_v46 = vmul.f32 %v3898_v47, %v3898_v47  ;;  %1509 = vadd.xlane.f32.xlu0 %v1508_v3  ;;  %v3904_v2 = vpop.f32.mrb[51].mxu0  ;;  %v3906_v0 = vpop.f32.mrb[51].mxu1  ;;  %v2307_v45 = vmul.f32 %v3900_v24, %v3900_v24 }
 0x14b   :  { %5057 = vst [vmem:[#allocation50_spill] sm:$0xff] %v3904_v2  ;;  %5058 = vst [vmem:[#allocation51_spill] sm:$0xff] %v3906_v0  ;;  %v2333_v7 = vadd.f32 %v2299_v23, %v2298_v12  ;;  %v2254_v63 = vadd.f32 %v2253_v40, %v3884_v27  ;;  %v2262_v20 = vadd.f32 %v3904_v2, %v3898_v47 }
 0x14c   :  { %v2306_v48 = vmul.f32 %v3904_v2, %v3904_v2  ;;  %v2308_v44 = vmul.f32 %v3906_v0, %v3906_v0 }
 0x14d   :  { %v2334_v3 = vadd.f32 %v2333_v7, %v2300_v57  ;;  %v2255_v15 = vadd.f32 %v2254_v63, %v3890_v37  ;;  %v2263_v12 = vadd.f32 %v2262_v20, %v3900_v24 }
 0x14e   :  { %v2342_v49 = vadd.f32 %v2306_v48, %v2305_v46  ;;  %1589 = vadd.xlane.f32.xlu0 %v1588_v10 }
 0x14f   :  { %v3919_v40 = vadd.f32 %v2334_v3, %v2301_v56  ;;  %v2264_v23 = vadd.f32 %v2263_v12, %v3906_v0  ;;  %v3924_v43 = vpop.f32.mrb[52].mxu0  ;;  %v3926_v31 = vpop.f32.mrb[52].mxu1 }
 0x150   :  { %v2343_v13 = vadd.f32 %v2342_v49, %v2307_v45  ;;  %5059 = vst [vmem:[#allocation52_spill] sm:$0xff] %v3924_v43  ;;  %5060 = vst [vmem:[#allocation53_spill] sm:$0xff] %v3926_v31  ;;  %v2312_v57 = vmul.f32 %v3924_v43, %v3924_v43  ;;  %v3930_v7 = vpop.f32.mrb[53].mxu0  ;;  %v3932_v46 = vpop.f32.mrb[53].mxu1  ;;  %v2314_v49 = vmul.f32 %v3926_v31, %v3926_v31 }
 0x151   :  { %5061 = vst [vmem:[#allocation54_spill] sm:$0xff] %v3930_v7  ;;  %5062 = vst [vmem:[#allocation55_spill] sm:$0xff] %v3932_v46  ;;  %v2271_v63 = vadd.f32 %v3930_v7, %v3924_v43  ;;  %v2313_v20 = vmul.f32 %v3930_v7, %v3930_v7  ;;  %v3942_v48 = vpop.f32.mrb[54].mxu0  ;;  %v3944_v56 = vpop.f32.mrb[54].mxu1  ;;  %v2315_v4 = vmul.f32 %v3932_v46, %v3932_v46 }
 0x152   :  { %v3934_v10 = vadd.f32 %v2343_v13, %v2308_v44  ;;  %5063 = vst [vmem:[#allocation56_spill] sm:$0xff] %v3942_v48  ;;  %5064 = vst [vmem:[#allocation57_spill] sm:$0xff] %v3944_v56  ;;  %v2319_v45 = vmul.f32 %v3942_v48, %v3942_v48  ;;  %v3948_v3 = vpop.f32.mrb[55].mxu0  ;;  %v3950_v13 = vpop.f32.mrb[55].mxu1  ;;  %v2321_v50 = vmul.f32 %v3944_v56, %v3944_v56 }
 0x153   :  { %5065 = vst [vmem:[#allocation58_spill] sm:$0xff] %v3948_v3  ;;  %5066 = vst [vmem:[#allocation59_spill] sm:$0xff] %v3950_v13  ;;  %v2351_v44 = vadd.f32 %v2313_v20, %v2312_v57  ;;  %v2272_v12 = vadd.f32 %v2271_v63, %v3926_v31  ;;  %v2280_v1 = vadd.f32 %v3948_v3, %v3942_v48 }
 0x154   :  { %v2320_v41 = vmul.f32 %v3948_v3, %v3948_v3  ;;  %v2322_v3 = vmul.f32 %v3950_v13, %v3950_v13 }
 0x155   :  { %v2352_v7 = vadd.f32 %v2351_v44, %v2314_v49  ;;  %v2273_v43 = vadd.f32 %v2272_v12, %v3932_v46  ;;  %v2281_v57 = vadd.f32 %v2280_v1, %v3944_v56 }
 0x156   :  { %v2360_v37 = vadd.f32 %v2320_v41, %v2319_v45 }
 0x157   :  { %v3963_v20 = vadd.f32 %v2352_v7, %v2315_v4  ;;  %v3966_v31 = vadd.f32 %v2281_v57, %v3950_v13  ;;  %v3970_v48 = vpop.f32.mrb[56].mxu0  ;;  %v3972_v27 = vpop.f32.mrb[56].mxu1 }
 0x158   :  { %v2361_v63 = vadd.f32 %v2360_v37, %v2321_v50  ;;  %5067 = vst [vmem:[#allocation60_spill] sm:$0xff] %v3970_v48  ;;  %5068 = vst [vmem:[#allocation61_spill] sm:$0xff] %v3972_v27  ;;  %v2326_v49 = vmul.f32 %v3970_v48, %v3970_v48  ;;  %v3976_v44 = vpop.f32.mrb[57].mxu0  ;;  %v3978_v41 = vpop.f32.mrb[57].mxu1  ;;  %v2328_v37 = vmul.f32 %v3972_v27, %v3972_v27 }
 0x159   :  { %5069 = vst [vmem:[#allocation62_spill] sm:$0xff] %v3976_v44  ;;  %5070 = vst [vmem:[#allocation63_spill] sm:$0xff] %v3978_v41  ;;  %v2289_v50 = vadd.f32 %v3976_v44, %v3970_v48  ;;  %v2327_v1 = vmul.f32 %v3976_v44, %v3976_v44  ;;  %v2072_v7 = vpop.f32.mrb[58].mxu0  ;;  %v2133_v45 = vpop.f32.mrb[58].mxu1 }
 0x15a   :  { %v3980_v4 = vadd.f32 %v2361_v63, %v2322_v3  ;;  %v2073_v12 = vpop.f32.mrb[59].mxu0  ;;  %v2134_v57 = vpop.f32.mrb[59].mxu1  ;;  %v2329_v63 = vmul.f32 %v3978_v41, %v3978_v41 }
 0x15b   :  { %v2369_v46 = vadd.f32 %v2327_v1, %v2326_v49  ;;  %v2290_v13 = vadd.f32 %v2289_v50, %v3972_v27 }
 0x15d   :  { %v2370_v56 = vadd.f32 %v2369_v46, %v2328_v37  ;;  %v3990_v3 = vadd.f32 %v2290_v13, %v3978_v41 }
 0x15f   :  { %v3994_v48 = vadd.f32 %v2370_v56, %v2329_v63  ;;  %v3996_v44 = vpop.f32.mrb[60].mxu0  ;;  %v3998_v19 = vpop.f32.mrb[60].mxu1 }
 0x160   :  { %5071 = vst [vmem:[#allocation64_spill] sm:$0xff] %v3996_v44  ;;  %5072 = vst [vmem:[#allocation65_spill] sm:$0xff] %v3998_v19  ;;  %v2256_v7 = vadd.f32 %v2255_v15, %v3996_v44  ;;  %v2302_v49 = vmul.f32 %v3996_v44, %v3996_v44  ;;  %v4003_v1 = vpop.f32.mrb[61].mxu0  ;;  %v2304_v46 = vmul.f32 %v3998_v19, %v3998_v19  ;;  %v2977_v13 = vpop.f32.mrb[61].mxu1  ;;  %v2258_v45 = vsel %vm684_vm5, %v3998_v19, 0.0 }
 0x161   :  { %5073 = vst [vmem:[#allocation66_spill] sm:$0xff] %v4003_v1  ;;  %v2303_v50 = vmul.f32 %v4003_v1, %v4003_v1  ;;  %v4009_v56 = vpop.f32.mrb[62].mxu0  ;;  %v4011_v37 = vpop.f32.mrb[62].mxu1 }
 0x162   :  { %5074 = vst [vmem:[#allocation67_spill] sm:$0xff] %v4009_v56  ;;  %5075 = vst [vmem:[#allocation68_spill] sm:$0xff] %v4011_v37  ;;  %v2265_v15 = vadd.f32 %v2264_v23, %v4009_v56  ;;  %v2309_v12 = vmul.f32 %v4009_v56, %v4009_v56  ;;  %v4018_v57 = vpop.f32.mrb[63].mxu0  ;;  %v2978_v63 = vpop.f32.mrb[63].mxu1  ;;  %v2257_v13 = vadd.f32 %v2256_v7, %v4003_v1  ;;  %v2338_v23 = vsel %vm684_vm5, %v2304_v46, 0.0 }
 0x163   :  { %5076 = vst [vmem:[#allocation69_spill] sm:$0xff] %v4018_v57  ;;  %v2310_v41 = vmul.f32 %v4018_v57, %v4018_v57  ;;  %v2311_v27 = vmul.f32 %v4011_v37, %v4011_v37  ;;  %v2336_v44 = vadd.f32 %v3919_v40, %v2302_v49  ;;  %v2267_v63 = vsel %vm684_vm5, %v4011_v37, 0.0 }
 0x164   :  { %v2259_v42 = vadd.f32 %v2258_v45, %v2257_v13  ;;  %v2266_v19 = vadd.f32 %v2265_v15, %v4018_v57  ;;  %v2345_v56 = vadd.f32 %v3934_v10, %v2309_v12 }
 0x165   :  { %v2337_v0 = vadd.f32 %v2336_v44, %v2303_v50  ;;  %v2347_v40 = vsel %vm684_vm5, %v2311_v27, 0.0 }
 0x166   :  { %2260 = vadd.xlane.f32.xlu1 %v2259_v42  ;;  %v2268_v7 = vadd.f32 %v2267_v63, %v2266_v19  ;;  %v2346_v1 = vadd.f32 %v2345_v56, %v2310_v41 }
 0x167   :  { %v4031_v24 = vpop.f32.mrb[64].mxu0  ;;  %v4033_v2 = vpop.f32.mrb[64].mxu1  ;;  %v2339_v47 = vadd.f32 %v2338_v23, %v2337_v0 }
 0x168   :  { %5077 = vst [vmem:[#allocation70_spill] sm:$0xff] %v4031_v24  ;;  %5078 = vst [vmem:[#allocation71_spill] sm:$0xff] %v4033_v2  ;;  %v2274_v49 = vadd.f32 %v2273_v43, %v4031_v24  ;;  %v2316_v46 = vmul.f32 %v4031_v24, %v4031_v24  ;;  %v2318_v10 = vmul.f32 %v4033_v2, %v4033_v2  ;;  %2269 = vadd.xlane.f32.xlu0 %v2268_v7  ;;  %v4041_v44 = vpop.f32.mrb[65].mxu0  ;;  %v2981_v42 = vpop.f32.mrb[65].mxu1 }
 0x169   :  { %5079 = vst [vmem:[#allocation72_spill] sm:$0xff] %v4041_v44  ;;  %v2348_v19 = vadd.f32 %v2347_v40, %v2346_v1  ;;  %v2317_v41 = vmul.f32 %v4041_v44, %v4041_v44  ;;  %v4045_v50 = vpop.f32.mrb[66].mxu0  ;;  %v4047_v0 = vpop.f32.mrb[66].mxu1  ;;  %v2276_v43 = vsel %vm684_vm5, %v4033_v2, 0.0 }
 0x16a   :  { %5080 = vst [vmem:[#allocation73_spill] sm:$0xff] %v4045_v50  ;;  %5081 = vst [vmem:[#allocation74_spill] sm:$0xff] %v4047_v0  ;;  %v2283_v27 = vadd.f32 %v3966_v31, %v4045_v50  ;;  %v2323_v56 = vmul.f32 %v4045_v50, %v4045_v50  ;;  %2340 = vadd.xlane.f32.xlu1 %v2339_v47  ;;  %v4055_v45 = vpop.f32.mrb[67].mxu0  ;;  %v2982_v1 = vpop.f32.mrb[67].mxu1  ;;  %v2275_v15 = vadd.f32 %v2274_v49, %v4041_v44 }
 0x16b   :  { %5082 = vst [vmem:[#allocation75_spill] sm:$0xff] %v4055_v45  ;;  %v2325_v12 = vmul.f32 %v4047_v0, %v4047_v0  ;;  %v2324_v13 = vmul.f32 %v4055_v45, %v4055_v45  ;;  %v2354_v23 = vadd.f32 %v3963_v20, %v2316_v46  ;;  %v2356_v7 = vsel %vm684_vm5, %v2318_v10, 0.0 }
 0x16c   :  { %2349 = vadd.xlane.f32.xlu0 %v2348_v19  ;;  %v2277_v63 = vadd.f32 %v2276_v43, %v2275_v15  ;;  %v2284_v31 = vadd.f32 %v2283_v27, %v4055_v45  ;;  %v2363_v47 = vadd.f32 %v3980_v4, %v2323_v56  ;;  %v2285_v40 = vsel %vm684_vm5, %v4047_v0, 0.0 }
 0x16d   :  { %v2355_v49 = vadd.f32 %v2354_v23, %v2317_v41  ;;  %v2365_v46 = vsel %vm684_vm5, %v2325_v12, 0.0 }
 0x16e   :  { %2278 = vadd.xlane.f32.xlu1 %v2277_v63  ;;  %v2286_v42 = vadd.f32 %v2285_v40, %v2284_v31  ;;  %v2364_v1 = vadd.f32 %v2363_v47, %v2324_v13 }
 0x16f   :  { %v4068_v2 = vpop.f32.mrb[68].mxu0  ;;  %v4070_v44 = vpop.f32.mrb[68].mxu1  ;;  %v2357_v20 = vadd.f32 %v2356_v7, %v2355_v49 }
 0x170   :  { %5083 = vst [vmem:[#allocation76_spill] sm:$0xff] %v4068_v2  ;;  %5084 = vst [vmem:[#allocation77_spill] sm:$0xff] %v4070_v44  ;;  %v2292_v19 = vadd.f32 %v3990_v3, %v4068_v2  ;;  %v2330_v4 = vmul.f32 %v4068_v2, %v4068_v2  ;;  %v2332_v10 = vmul.f32 %v4070_v44, %v4070_v44  ;;  %2287 = vadd.xlane.f32.xlu0 %v2286_v42  ;;  %v4079_v41 = vpop.f32.mrb[69].mxu0  ;;  %v2985_v43 = vpop.f32.mrb[69].mxu1 }
 0x171   :  { %5085 = vst [vmem:[#allocation78_spill] sm:$0xff] %v4079_v41  ;;  %v2366_v27 = vadd.f32 %v2365_v46, %v2364_v1  ;;  %v2331_v56 = vmul.f32 %v4079_v41, %v4079_v41  ;;  %v2194_v15 = vpop.f32.mrb[70].mxu0  ;;  %v2250_v13 = vpop.f32.mrb[70].mxu1  ;;  %v2294_v12 = vsel %vm684_vm5, %v4070_v44, 0.0 }
 0x172   :  { %2358 = vadd.xlane.f32.xlu1 %v2357_v20  ;;  %v2195_v3 = vpop.f32.mrb[71].mxu0  ;;  %v2986_v23 = vpop.f32.mrb[71].mxu1  ;;  %v2293_v63 = vadd.f32 %v2292_v19, %v4079_v41  ;;  %v2372_v31 = vadd.f32 %v3994_v48, %v2330_v4  ;;  %v2374_v7 = vsel %vm684_vm5, %v2332_v10, 0.0 }
 0x174   :  { %2367 = vadd.xlane.f32.xlu0 %v2366_v27  ;;  %v2295_v47 = vadd.f32 %v2294_v12, %v2293_v63  ;;  %v2373_v40 = vadd.f32 %v2372_v31, %v2331_v56 }
 0x176   :  { %2296 = vadd.xlane.f32.xlu1 %v2295_v47  ;;  %v2375_v49 = vadd.f32 %v2374_v7, %v2373_v40 }
 0x17a   :  { %2376 = vadd.xlane.f32.xlu1 %v2375_v49 }
 0x193   :  { %v688_v42 = vpop.xlane.xlu0 %687 }
 0x194   :  { %v805_v1 = vmul.f32 0.0012755102, %v688_v42 }
 0x196   :  { %v815_v46 = vmul.f32 %v805_v1, %v805_v1  ;;  %v768_v43 = vpop.xlane.xlu1 %767 }
 0x197   :  { %v810_v15 = vmul.f32 0.0012755102, %v768_v43  ;;  %v697_v20 = vpop.xlane.xlu0 %696 }
 0x198   :  { %v806_v13 = vmul.f32 0.0012755102, %v697_v20 }
 0x199   :  { %v820_v3 = vsub.f32 %v810_v15, %v815_v46  ;;  %v4091_v15 = vld [vmem:[%s4929_s2] sm:$0xff] }
 0x19a   :  { %v816_v48 = vmul.f32 %v806_v13, %v806_v13 }
 0x19b   :  { %v830_v23 = vadd.f32 0.001, %v820_v3  ;;  %v777_v19 = vpop.xlane.xlu0 %776  ;;  %v706_v44 = vpop.xlane.xlu1 %705 }
 0x19c   :  { %v811_v4 = vmul.f32 0.0012755102, %v777_v19  ;;  %v807_v63 = vmul.f32 0.0012755102, %v706_v44 }
 0x19d   :  { %3014 = vrsqrt.f32 %v830_v23 }
 0x19e   :  { %v821_v10 = vsub.f32 %v811_v4, %v816_v48  ;;  %v817_v49 = vmul.f32 %v807_v63, %v807_v63 }
 0x19f   :  { %v715_v56 = vpop.xlane.xlu1 %714 }
 0x1a0   :  { %v795_v27 = vpop.xlane.xlu0 %794  ;;  %v831_v12 = vadd.f32 0.001, %v821_v10  ;;  %v808_v31 = vmul.f32 0.0012755102, %v715_v56 }
 0x1a1   :  { %v813_v46 = vmul.f32 0.0012755102, %v795_v27  ;;  %v4097_v27 = vld [vmem:[%s4929_s2 + $0x8] sm:$0xff] }
 0x1a2   :  { %3016 = vrsqrt.f32 %v831_v12  ;;  %v818_v7 = vmul.f32 %v808_v31, %v808_v31 }
 0x1a3   :  { %v786_v47 = vpop.xlane.xlu1 %785 }
 0x1a4   :  { %v724_v40 = vpop.xlane.xlu0 %723  ;;  %v812_v42 = vmul.f32 0.0012755102, %v786_v47  ;;  %v823_v23 = vsub.f32 %v813_v46, %v818_v7 }
 0x1a5   :  { %v809_v43 = vmul.f32 0.0012755102, %v724_v40 }
 0x1a6   :  { %v822_v20 = vsub.f32 %v812_v42, %v817_v49  ;;  %v833_v40 = vadd.f32 0.001, %v823_v23 }
 0x1a7   :  { %v3015_v3 = vpop.eup %3014  ;;  %v804_v19 = vpop.xlane.xlu1 %803  ;;  %v819_v44 = vmul.f32 %v809_v43, %v809_v43 }
 0x1a8   :  { %v832_v48 = vadd.f32 0.001, %v822_v20  ;;  %v814_v4 = vmul.f32 0.0012755102, %v804_v19  ;;  %v840_v10 = vmul.f32 %v3015_v3, %v4091_v15  ;;  %v4111_v3 = vld [vmem:[%s4929_s2 + $0x20] sm:$0xff] }
 0x1aa   :  { %3018 = vrsqrt.f32 %v832_v48  ;;  %v824_v56 = vsub.f32 %v814_v4, %v819_v44  ;;  %877 = vperm.xlu1 %2992, %v840_v10   ;;  %v845_v12 = vmul.f32 %v840_v10, %v805_v1  ;;  %v4105_v1 = vld [vmem:[%s4929_s2 + $0x10] sm:$0xff]  ;;  %v4117_v44 = vld [vmem:[%s4929_s2 + $0x18] sm:$0xff] }
 0x1ac   :  { %v3017_v47 = vpop.eup %3016  ;;  %v834_v49 = vadd.f32 0.001, %v824_v56  ;;  %855 = vrot.lane.b32.xlu0 %v845_v12, %s3065_s6 }
 0x1ad   :  { %v841_v7 = vmul.f32 %v3017_v47, %v4097_v27 }
 0x1ae   :  { %3020 = vrsqrt.f32 %v834_v49 }
 0x1af   :  { %v846_v42 = vmul.f32 %v841_v7, %v806_v13  ;;  %3022 = vrsqrt.f32 %v833_v40 }
 0x1b0   :  { %882 = vperm.xlu0 %2993, %v841_v7  }
 0x1b1   :  { %857 = vrot.lane.b32.xlu1 %v846_v42, %s3065_s6 }
 0x1b4   :  { %v3019_v46 = vpop.eup %3018 }
 0x1b5   :  { %v842_v20 = vmul.f32 %v3019_v46, %v4105_v1 }
 0x1b7   :  { %887 = vperm.xlu1 %2992, %v842_v20   ;;  %v847_v13 = vmul.f32 %v842_v20, %v807_v63 }
 0x1b8   :  { %v3021_v23 = vpop.eup %3020 }
 0x1b9   :  { %v844_v19 = vmul.f32 %v3021_v23, %v4111_v3  ;;  %v3023_v48 = vpop.eup %3022 }
 0x1ba   :  { %v843_v10 = vmul.f32 %v3023_v48, %v4117_v44 }
 0x1bb   :  { %859 = vrot.lane.b32.xlu1 %v847_v13, %s3065_s6  ;;  %v849_v4 = vmul.f32 %v844_v19, %v809_v43 }
 0x1bc   :  { %v848_v56 = vmul.f32 %v843_v10, %v808_v31 }
 0x1bd   :  { %863 = vrot.lane.b32.xlu0 %v849_v4, %s3065_s6 }
 0x1bf   :  { %892 = vperm.xlu1 %2992, %v843_v10  }
 0x1c3   :  { %v1474_v12 = vpop.xlane.xlu0 %1473  ;;  %861 = vrot.lane.b32.xlu1 %v848_v56, %s3065_s6 }
 0x1c4   :  { %v1591_v63 = vmul.f32 0.0012755102, %v1474_v12 }
 0x1c5   :  { %v1483_v47 = vpop.xlane.xlu1 %1482 }
 0x1c6   :  { %v1592_v40 = vmul.f32 0.0012755102, %v1483_v47  ;;  %v1601_v7 = vmul.f32 %v1591_v63, %v1591_v63 }
 0x1c7   :  { %v1554_v49 = vpop.xlane.xlu0 %1553  ;;  %897 = vperm.xlu1 %2992, %v844_v19  }
 0x1c8   :  { %v1596_v42 = vmul.f32 0.0012755102, %v1554_v49  ;;  %v1602_v20 = vmul.f32 %v1592_v40, %v1592_v40 }
 0x1c9   :  { %v1563_v46 = vpop.xlane.xlu1 %1562 }
 0x1ca   :  { %v1606_v23 = vsub.f32 %v1596_v42, %v1601_v7  ;;  %v1597_v43 = vmul.f32 0.0012755102, %v1563_v46  ;;  %v4126_v7 = vld [vmem:[%s4929_s2 + $0x28] sm:$0xff] }
 0x1cb   :  { %v1492_v13 = vpop.xlane.xlu0 %1491  ;;  %5086 = vst [vmem:[#allocation79_spill] sm:$0xff] %v4126_v7 }
 0x1cc   :  { %v1617_v48 = vadd.f32 0.001, %v1606_v23  ;;  %v1607_v41 = vsub.f32 %v1597_v43, %v1602_v20  ;;  %v1593_v56 = vmul.f32 0.0012755102, %v1492_v13  ;;  %v4131_v23 = vld [vmem:[%s4929_s2 + $0x30] sm:$0xff] }
 0x1cd   :  { %5087 = vst [vmem:[#allocation80_spill] sm:$0xff] %v4131_v23 }
 0x1ce   :  { %3024 = vrsqrt.f32 %v1617_v48  ;;  %v1618_v4 = vadd.f32 0.001, %v1607_v41  ;;  %v1603_v19 = vmul.f32 %v1593_v56, %v1593_v56 }
 0x1cf   :  { %v1501_v10 = vpop.xlane.xlu0 %1500 }
 0x1d0   :  { %v1581_v31 = vpop.xlane.xlu1 %1580  ;;  %3026 = vrsqrt.f32 %v1618_v4  ;;  %v1594_v12 = vmul.f32 0.0012755102, %v1501_v10 }
 0x1d1   :  { %v1599_v2 = vmul.f32 0.0012755102, %v1581_v31  ;;  %v4145_v31 = vld [vmem:[%s4929_s2 + $0x40] sm:$0xff] }
 0x1d2   :  { %v1604_v47 = vmul.f32 %v1594_v12, %v1594_v12  ;;  %5088 = vst [vmem:[#allocation81_spill] sm:$0xff] %v4145_v31 }
 0x1d3   :  { %v1572_v24 = vpop.xlane.xlu0 %1571 }
 0x1d4   :  { %v1609_v0 = vsub.f32 %v1599_v2, %v1604_v47  ;;  %v1598_v49 = vmul.f32 0.0012755102, %v1572_v24 }
 0x1d6   :  { %v1620_v45 = vadd.f32 0.001, %v1609_v0  ;;  %v1608_v50 = vsub.f32 %v1598_v49, %v1603_v19 }
 0x1d7   :  { %v1510_v42 = vpop.xlane.xlu0 %1509 }
 0x1d8   :  { %v3025_v41 = vpop.eup %3024  ;;  %3028 = vrsqrt.f32 %v1620_v45  ;;  %v1619_v46 = vadd.f32 0.001, %v1608_v50  ;;  %v1595_v20 = vmul.f32 0.0012755102, %v1510_v42 }
 0x1d9   :  { %v4134_v2 = vmul.f32 %v3025_v41, %v4126_v7 }
 0x1da   :  { %v3027_v24 = vpop.eup %3026  ;;  %3030 = vrsqrt.f32 %v1619_v46  ;;  %v1605_v48 = vmul.f32 %v1595_v20, %v1595_v20  ;;  %v4166_v46 = vld [vmem:[%s4929_s2 + $0x48] sm:$0xff] }
 0x1db   :  { %v1590_v0 = vpop.xlane.xlu0 %1589  ;;  %v1632_v43 = vmul.f32 %v4134_v2, %v1591_v63  ;;  %v4138_v13 = vmul.f32 %v3027_v24, %v4131_v23  ;;  %v4151_v63 = vld [vmem:[%s4929_s2 + $0x38] sm:$0xff]  ;;  %5090 = vst [vmem:[#allocation83_spill] sm:$0xff] %v4166_v46 }
 0x1dc   :  { %v1600_v45 = vmul.f32 0.0012755102, %v1590_v0  ;;  %5089 = vst [vmem:[#allocation82_spill] sm:$0xff] %v4151_v63 }
 0x1dd   :  { %1642 = vrot.lane.b32.xlu1 %v1632_v43, %s3065_s6  ;;  %v1633_v4 = vmul.f32 %v4138_v13, %v1592_v40 }
 0x1de   :  { %v1610_v50 = vsub.f32 %v1600_v45, %v1605_v48 }
 0x1e0   :  { %v1621_v10 = vadd.f32 0.001, %v1610_v50 }
 0x1e1   :  { %1644 = vrot.lane.b32.xlu1 %v1633_v4, %s3065_s6 }
 0x1e2   :  { %v3029_v47 = vpop.eup %3028  ;;  %3032 = vrsqrt.f32 %v1621_v10 }
 0x1e3   :  { %v4154_v19 = vmul.f32 %v3029_v47, %v4145_v31 }
 0x1e4   :  { %v3031_v49 = vpop.eup %3030 }
 0x1e5   :  { %v1635_v40 = vmul.f32 %v4154_v19, %v1594_v12  ;;  %v4158_v42 = vmul.f32 %v3031_v49, %v4151_v63 }
 0x1e7   :  { %1648 = vrot.lane.b32.xlu0 %v1635_v40, %s3065_s6  ;;  %v1634_v41 = vmul.f32 %v4158_v42, %v1593_v56 }
 0x1e9   :  { %1646 = vrot.lane.b32.xlu1 %v1634_v41, %s3065_s6 }
 0x1ec   :  { %v3033_v24 = vpop.eup %3032 }
 0x1ed   :  { %v4169_v0 = vmul.f32 %v3033_v24, %v4166_v46 }
 0x1ef   :  { %v1636_v12 = vmul.f32 %v4169_v0, %v1595_v20 }
 0x1f1   :  { %1650 = vrot.lane.b32.xlu1 %v1636_v12, %s3065_s6 }
 0x1f3   :  { %v2261_v43 = vpop.xlane.xlu1 %2260 }
 0x1f4   :  { %v2378_v48 = vmul.f32 0.0012755102, %v2261_v43 }
 0x1f5   :  { %v2270_v45 = vpop.xlane.xlu0 %2269 }
 0x1f6   :  { %v2379_v50 = vmul.f32 0.0012755102, %v2270_v45  ;;  %v2388_v4 = vmul.f32 %v2378_v48, %v2378_v48 }
 0x1f7   :  { %v2341_v56 = vpop.xlane.xlu1 %2340 }
 0x1f8   :  { %v2383_v10 = vmul.f32 0.0012755102, %v2341_v56  ;;  %v2389_v49 = vmul.f32 %v2379_v50, %v2379_v50 }
 0x1f9   :  { %v2350_v47 = vpop.xlane.xlu0 %2349 }
 0x1fa   :  { %v2393_v40 = vsub.f32 %v2383_v10, %v2388_v4  ;;  %v2384_v41 = vmul.f32 0.0012755102, %v2350_v47 }
 0x1fb   :  { %v2279_v37 = vpop.xlane.xlu1 %2278 }
 0x1fc   :  { %v2404_v57 = vadd.f32 0.001, %v2393_v40  ;;  %v2394_v63 = vsub.f32 %v2384_v41, %v2389_v49  ;;  %v2380_v24 = vmul.f32 0.0012755102, %v2279_v37  ;;  %v4176_v37 = vld [vmem:[%s4929_s2 + $0x50] sm:$0xff] }
 0x1fd   :  { %v2288_v46 = vpop.xlane.xlu0 %2287 }
 0x1fe   :  { %3034 = vrsqrt.f32 %v2404_v57  ;;  %v2405_v20 = vadd.f32 0.001, %v2394_v63  ;;  %v2381_v31 = vmul.f32 0.0012755102, %v2288_v46  ;;  %v2390_v43 = vmul.f32 %v2380_v24, %v2380_v24 }
 0x1ff   :  { %v2359_v12 = vpop.xlane.xlu1 %2358 }
 0x200   :  { %3036 = vrsqrt.f32 %v2405_v20  ;;  %v2385_v23 = vmul.f32 0.0012755102, %v2359_v12  ;;  %v2391_v7 = vmul.f32 %v2381_v31, %v2381_v31  ;;  %v4189_v12 = vld [vmem:[%s4929_s2 + $0x60] sm:$0xff] }
 0x201   :  { %v2368_v45 = vpop.xlane.xlu0 %2367 }
 0x202   :  { %v2395_v51 = vsub.f32 %v2385_v23, %v2390_v43  ;;  %v2386_v56 = vmul.f32 0.0012755102, %v2368_v45  ;;  %v4181_v23 = vld [vmem:[%s4929_s2 + $0x58] sm:$0xff]  ;;  %v4195_v45 = vld [vmem:[%s4929_s2 + $0x68] sm:$0xff] }
 0x203   :  { %v2297_v18 = vpop.xlane.xlu1 %2296 }
 0x204   :  { %v2406_v53 = vadd.f32 0.001, %v2395_v51  ;;  %v2396_v4 = vsub.f32 %v2386_v56, %v2391_v7  ;;  %v2382_v10 = vmul.f32 0.0012755102, %v2297_v18 }
 0x206   :  { %3038 = vrsqrt.f32 %v2406_v53  ;;  %v2407_v47 = vadd.f32 0.001, %v2396_v4  ;;  %v2392_v46 = vmul.f32 %v2382_v10, %v2382_v10 }
 0x207   :  { %v2377_v57 = vpop.xlane.xlu1 %2376 }
 0x208   :  { %v3035_v63 = vpop.eup %3034  ;;  %3040 = vrsqrt.f32 %v2407_v47  ;;  %v2387_v49 = vmul.f32 0.0012755102, %v2377_v57  ;;  %v4203_v57 = vld [vmem:[%s4929_s2 + $0x70] sm:$0xff] }
 0x209   :  { %v2414_v51 = vmul.f32 %v3035_v63, %v4176_v37 }
 0x20a   :  { %v3037_v18 = vpop.eup %3036  ;;  %v2397_v53 = vsub.f32 %v2387_v49, %v2392_v46 }
 0x20b   :  { %v2419_v7 = vmul.f32 %v2414_v51, %v2378_v48  ;;  %v2415_v40 = vmul.f32 %v3037_v18, %v4181_v23 }
 0x20c   :  { %v2408_v41 = vadd.f32 0.001, %v2397_v53 }
 0x20d   :  { %2429 = vrot.lane.b32.xlu0 %v2419_v7, %s3065_s6  ;;  %v2420_v20 = vmul.f32 %v2415_v40, %v2379_v50 }
 0x20e   :  { %3042 = vrsqrt.f32 %v2408_v41 }
 0x20f   :  { %2431 = vrot.lane.b32.xlu1 %v2420_v20, %s3065_s6 }
 0x210   :  { %v3039_v43 = vpop.eup %3038 }
 0x211   :  { %v2416_v48 = vmul.f32 %v3039_v43, %v4189_v12 }
 0x212   :  { %v3041_v56 = vpop.eup %3040 }
 0x213   :  { %v2421_v4 = vmul.f32 %v2416_v48, %v2380_v24  ;;  %v2417_v50 = vmul.f32 %v3041_v56, %v4195_v45 }
 0x215   :  { %2433 = vrot.lane.b32.xlu0 %v2421_v4, %s3065_s6  ;;  %v2422_v47 = vmul.f32 %v2417_v50, %v2381_v31 }
 0x217   :  { %2435 = vrot.lane.b32.xlu1 %v2422_v47, %s3065_s6  ;;  %v5094_v47 = vld [vmem:[#allocation8_spill] sm:$0xff] }
 0x218   :  { %v3043_v63 = vpop.eup %3042 }
 0x219   :  { %v2418_v46 = vmul.f32 %v3043_v63, %v4203_v57 }
 0x21b   :  { %1664 = vperm.xlu1 %2992, %v4134_v2   ;;  %v2423_v49 = vmul.f32 %v2418_v46, %v2382_v10 }
 0x21d   :  { %2437 = vrot.lane.b32.xlu0 %v2423_v49, %s3065_s6  ;;  %v5096_v49 = vld [vmem:[#allocation79_spill] sm:$0xff] }
 0x21f   :  { %1674 = vperm.xlu1 %2992, %v4158_v42  }
 0x221   :  { %1669 = vperm.xlu0 %2993, %v4138_v13   ;;  %v856_v13 = vpop.permute.xlu0 %855 }
 0x223   :  { %1679 = vperm.xlu1 %2992, %v4154_v19  }
 0x225   :  { %1684 = vperm.xlu0 %2993, %v4169_v0  }
 0x227   :  { %2456 = vperm.xlu1 %2992, %v2415_v40  }
 0x229   :  { %v878_v31 = vpop.permute.xlu1 %877  ;;  %2451 = vperm.xlu0 %2993, %v2414_v51   ;;  %v3066_v51 = vmov 1  }
 0x22a   :  { %v4214_v24 = vmul.f32 %v878_v31, %v3470_v33  ;;  %v4217_v18 = vmul.f32 %v878_v31, %v3476_v54  ;;  %v4220_v2 = vmul.f32 %v878_v31, %v3472_v34  ;;  %v4223_v42 = vmul.f32 %v878_v31, %v3478_v55 }
 0x22b   :  { %v4226_v19 = vmul.f32 %v878_v31, %v3584_v5  ;;  %v4229_v0 = vmul.f32 %v878_v31, %v3591_v11  ;;  %v4232_v10 = vmul.f32 %v878_v31, %v3586_v6  ;;  %2466 = vperm.xlu1 %2992, %v2417_v50   ;;  %v870_v33 = vsub.f32 %v4091_v15, %v856_v13  ;;  %v5097_v13 = vld [vmem:[#allocation80_spill] sm:$0xff] }
 0x22d   :  { %2461 = vperm.xlu0 %2993, %v2416_v48   ;;  %v858_v54 = vpop.permute.xlu1 %857 }
 0x22f   :  { %v883_v34 = vpop.permute.xlu0 %882  ;;  %2994 = vset.pattern.permute.xlu1 %v3066_v51 }
 0x230   :  { %v4236_v55 = vmul.f32 %v883_v34, %v3486_v58  ;;  %v4239_v5 = vmul.f32 %v883_v34, %v3492_v61  ;;  %v4242_v11 = vmul.f32 %v883_v34, %v3488_v59  ;;  %v4245_v6 = vmul.f32 %v883_v34, %v3494_v62  ;;  %937 = vperm.xlu1 %2994, %v870_v33  }
 0x231   :  { %v4248_v53 = vmul.f32 %v883_v34, %v3597_v26  ;;  %v4251_v15 = vmul.f32 %v883_v34, %v3606_v38  ;;  %v4254_v7 = vmul.f32 %v883_v34, %v3599_v28  ;;  %2471 = vperm.xlu0 %2993, %v2418_v46   ;;  %v871_v58 = vsub.f32 %v4097_v27, %v858_v54  ;;  %v5098_v34 = vld [vmem:[#allocation81_spill] sm:$0xff] }
 0x233   :  { %v864_v41 = vpop.permute.xlu0 %863 }
 0x234   :  { %942 = vperm.xlu1 %2994, %v871_v58  }
 0x235   :  { %2995 = vset.pattern.permute.xlu0 %v3066_v51 }
 0x236   :  { %v888_v59 = vpop.permute.xlu1 %887 }
 0x237   :  { %v4258_v61 = vmul.f32 %v888_v59, %v3512_v16  ;;  %v4261_v62 = vmul.f32 %v888_v59, %v3518_v21  ;;  %v4264_v26 = vmul.f32 %v888_v59, %v3514_v17  ;;  %v4267_v38 = vmul.f32 %v888_v59, %v3520_v22 }
 0x238   :  { %v4270_v28 = vmul.f32 %v888_v59, %v3619_v32  ;;  %v4273_v27 = vmul.f32 %v888_v59, %v3629_v60  ;;  %v4276_v40 = vmul.f32 %v888_v59, %v3621_v39  ;;  %v874_v17 = vsub.f32 %v4111_v3, %v864_v41  ;;  %v5099_v59 = vld [vmem:[#allocation82_spill] sm:$0xff] }
 0x23a   :  { %v860_v16 = vpop.permute.xlu1 %859 }
 0x23b   :  { %v872_v21 = vsub.f32 %v4105_v1, %v860_v16 }
 0x23d   :  { %947 = vperm.xlu1 %2994, %v872_v21   ;;  %v5100_v21 = vld [vmem:[#allocation83_spill] sm:$0xff] }
 0x23e   :  { %v893_v20 = vpop.permute.xlu1 %892 }
 0x23f   :  { %v4281_v22 = vmul.f32 %v893_v20, %v3530_v29  ;;  %v4284_v32 = vmul.f32 %v893_v20, %v3536_v35  ;;  %v4287_v60 = vmul.f32 %v893_v20, %v3532_v30  ;;  %v4290_v39 = vmul.f32 %v893_v20, %v3538_v36 }
 0x240   :  { %v4293_v43 = vmul.f32 %v893_v20, %v3633_v8  ;;  %v4296_v1 = vmul.f32 %v893_v20, %v3643_v25  ;;  %v4299_v3 = vmul.f32 %v893_v20, %v3635_v9  ;;  %v5091_v8 = vld [vmem:[#allocation4_spill] sm:$0xff]  ;;  %v5092_v25 = vld [vmem:[#allocation5_spill] sm:$0xff]  ;;  %v5093_v9 = vld [vmem:[#allocation6_spill] sm:$0xff] }
 0x241   :  { %957 = vperm.xlu1 %2994, %v874_v17  }
 0x242   :  { %v862_v29 = vpop.permute.xlu1 %861 }
 0x243   :  { %v873_v35 = vsub.f32 %v4117_v44, %v862_v29  ;;  %v5095_v44 = vld [vmem:[#allocation7_spill] sm:$0xff] }
 0x245   :  { %952 = vperm.xlu0 %2995, %v873_v35  }
 0x246   :  { %v898_v48 = vpop.permute.xlu1 %897 }
 0x247   :  { %v4303_v30 = vmul.f32 %v898_v48, %v3558_v52  ;;  %v4306_v36 = vmul.f32 %v898_v48, %v3564_v14  ;;  %v4309_v56 = vmul.f32 %v898_v48, %v5091_v8  ;;  %v4312_v4 = vmul.f32 %v898_v48, %v5092_v25 }
 0x248   :  { %v4315_v50 = vmul.f32 %v898_v48, %v5093_v9  ;;  %v4318_v63 = vmul.f32 %v898_v48, %v5094_v47  ;;  %v4321_v46 = vmul.f32 %v898_v48, %v5095_v44 }
 0x24f   :  { %v1643_v52 = vpop.permute.xlu1 %1642 }
 0x250   :  { %v1657_v31 = vsub.f32 %v5096_v49, %v1643_v52 }
 0x252   :  { %1724 = vperm.xlu1 %2994, %v1657_v31  }
 0x253   :  { %v1645_v14 = vpop.permute.xlu1 %1644 }
 0x254   :  { %v1658_v33 = vsub.f32 %v5097_v13, %v1645_v14  ;;  %v5101_v13 = vld [vmem:[#allocation48_spill] sm:$0xff] }
 0x256   :  { %1729 = vperm.xlu1 %2994, %v1658_v33  }
 0x259   :  { %v1649_v54 = vpop.permute.xlu0 %1648 }
 0x25a   :  { %v1660_v51 = vsub.f32 %v5098_v34, %v1649_v54  ;;  %v5105_v34 = vld [vmem:[#allocation49_spill] sm:$0xff] }
 0x25b   :  { %v1647_v58 = vpop.permute.xlu1 %1646 }
 0x25c   :  { %v1659_v16 = vsub.f32 %v5099_v59, %v1647_v58  ;;  %1739 = vperm.xlu1 %2994, %v1660_v51   ;;  %v5107_v51 = vld [vmem:[#allocation51_spill] sm:$0xff] }
 0x25d   :  { %v5109_v59 = vld [vmem:[#allocation67_spill] sm:$0xff] }
 0x25e   :  { %1734 = vperm.xlu0 %2995, %v1659_v16  }
 0x263   :  { %v1651_v41 = vpop.permute.xlu1 %1650 }
 0x264   :  { %v1661_v17 = vsub.f32 %v5100_v21, %v1651_v41  ;;  %v5111_v41 = vld [vmem:[#allocation69_spill] sm:$0xff] }
 0x266   :  { %1744 = vperm.xlu1 %2994, %v1661_v17   ;;  %v5113_v17 = vld [vmem:[#allocation68_spill] sm:$0xff] }
 0x27f   :  { %v2430_v20 = vpop.permute.xlu0 %2429 }
 0x280   :  { %v2444_v29 = vsub.f32 %v4176_v37, %v2430_v20 }
 0x281   :  { %v2432_v35 = vpop.permute.xlu1 %2431 }
 0x282   :  { %v2445_v48 = vsub.f32 %v4181_v23, %v2432_v35  ;;  %2511 = vperm.xlu0 %2995, %v2444_v29   ;;  %v5115_v35 = vld [vmem:[#allocation44_spill] sm:$0xff] }
 0x284   :  { %2516 = vperm.xlu1 %2994, %v2445_v48  }
 0x287   :  { %v2434_v8 = vpop.permute.xlu0 %2433 }
 0x288   :  { %v2446_v25 = vsub.f32 %v4189_v12, %v2434_v8  ;;  %v5116_v8 = vld [vmem:[#allocation46_spill] sm:$0xff] }
 0x289   :  { %v2436_v9 = vpop.permute.xlu1 %2435 }
 0x28a   :  { %v2447_v47 = vsub.f32 %v4195_v45, %v2436_v9  ;;  %2521 = vperm.xlu0 %2995, %v2446_v25   ;;  %v5103_v45 = vld [vmem:[#allocation50_spill] sm:$0xff]  ;;  %v5117_v9 = vld [vmem:[#allocation45_spill] sm:$0xff] }
 0x28c   :  { %2526 = vperm.xlu1 %2994, %v2447_v47  }
 0x28f   :  { %v2438_v44 = vpop.permute.xlu0 %2437 }
 0x290   :  { %v2448_v52 = vsub.f32 %v4203_v57, %v2438_v44  ;;  %v5118_v44 = vld [vmem:[#allocation47_spill] sm:$0xff] }
 0x292   :  { %2531 = vperm.xlu0 %2995, %v2448_v52  }
 0x29a   :  { %v4333_v49 = vpop.permute.xlu1 %1664 }
 0x29e   :  { %v4335_v37 = vpop.permute.xlu1 %1674 }
 0x2a0   :  { %v4337_v31 = vpop.permute.xlu0 %1669 }
 0x2a2   :  { %v4339_v23 = vpop.permute.xlu1 %1679 }
 0x2a4   :  { %v4341_v14 = vpop.permute.xlu0 %1684 }
 0x2a6   :  { %v2457_v12 = vpop.permute.xlu1 %2456 }
 0x2a7   :  { %v4344_v33 = vmul.f32 %v2457_v12, %v5101_v13  ;;  %v4347_v54 = vmul.f32 %v2457_v12, %v5103_v45  ;;  %v4350_v57 = vmul.f32 %v2457_v12, %v5105_v34  ;;  %v4353_v58 = vmul.f32 %v2457_v12, %v5107_v51  ;;  %v5119_v13 = vld [vmem:[#allocation64_spill] sm:$0xff]  ;;  %v5120_v34 = vld [vmem:[#allocation66_spill] sm:$0xff] }
 0x2a8   :  { %v4356_v16 = vmul.f32 %v2457_v12, %v5109_v59  ;;  %v4359_v21 = vmul.f32 %v2457_v12, %v5111_v41  ;;  %v4362_v20 = vmul.f32 %v2457_v12, %v5113_v17  ;;  %v2452_v29 = vpop.permute.xlu0 %2451  ;;  %v5121_v12 = vld [vmem:[#allocation65_spill] sm:$0xff]  ;;  %v5122_v17 = vld [vmem:[#allocation56_spill] sm:$0xff] }
 0x2a9   :  { %5102 = vst [vmem:[#allocation4_spill] sm:$0xff] %v4344_v33  ;;  %5104 = vst [vmem:[#allocation5_spill] sm:$0xff] %v4347_v54  ;;  %v4365_v48 = vmul.f32 %v2452_v29, %v5115_v35  ;;  %v4368_v25 = vmul.f32 %v2452_v29, %v5116_v8  ;;  %v4371_v47 = vmul.f32 %v2452_v29, %v5117_v9  ;;  %v5124_v8 = vld [vmem:[#allocation58_spill] sm:$0xff]  ;;  %v5126_v9 = vld [vmem:[#allocation57_spill] sm:$0xff] }
 0x2aa   :  { %5106 = vst [vmem:[#allocation6_spill] sm:$0xff] %v4350_v57  ;;  %5108 = vst [vmem:[#allocation8_spill] sm:$0xff] %v4353_v58  ;;  %v4374_v52 = vmul.f32 %v2452_v29, %v5118_v44  ;;  %v4377_v45 = vmul.f32 %v2452_v29, %v5119_v13  ;;  %v4380_v51 = vmul.f32 %v2452_v29, %v5120_v34  ;;  %v2467_v41 = vpop.permute.xlu1 %2466  ;;  %v5128_v44 = vld [vmem:[#allocation59_spill] sm:$0xff]  ;;  %v5130_v58 = vld [vmem:[#allocation73_spill] sm:$0xff] }
 0x2ab   :  { %5110 = vst [vmem:[#allocation7_spill] sm:$0xff] %v4356_v16  ;;  %5112 = vst [vmem:[#allocation79_spill] sm:$0xff] %v4359_v21  ;;  %v4383_v59 = vmul.f32 %v2452_v29, %v5121_v12  ;;  %v4386_v35 = vmul.f32 %v2467_v41, %v5122_v17  ;;  %v4392_v21 = vmul.f32 %v2467_v41, %v5126_v9  ;;  %v5132_v57 = vld [vmem:[#allocation75_spill] sm:$0xff]  ;;  %v5134_v12 = vld [vmem:[#allocation74_spill] sm:$0xff] }
 0x2ac   :  { %5114 = vst [vmem:[#allocation80_spill] sm:$0xff] %v4362_v20  ;;  %v4389_v20 = vmul.f32 %v2467_v41, %v5124_v8  ;;  %v4395_v16 = vmul.f32 %v2467_v41, %v5128_v44  ;;  %v2462_v13 = vpop.permute.xlu0 %2461  ;;  %v4398_v34 = vmul.f32 %v2467_v41, %v5130_v58  ;;  %v4401_v29 = vmul.f32 %v2467_v41, %v5132_v57  ;;  %v5136_v17 = vld [vmem:[#allocation52_spill] sm:$0xff]  ;;  %v5138_v8 = vld [vmem:[#allocation54_spill] sm:$0xff]  ;;  %v5140_v9 = vld [vmem:[#allocation53_spill] sm:$0xff] }
 0x2ad   :  { %5123 = vst [vmem:[#allocation81_spill] sm:$0xff] %v4386_v35  ;;  %5127 = vst [vmem:[#allocation83_spill] sm:$0xff] %v4392_v21  ;;  %v4404_v54 = vmul.f32 %v2467_v41, %v5134_v12  ;;  %v4407_v35 = vmul.f32 %v2462_v13, %v5136_v17  ;;  %v4413_v21 = vmul.f32 %v2462_v13, %v5140_v9  ;;  %v5142_v44 = vld [vmem:[#allocation55_spill] sm:$0xff]  ;;  %v5144_v58 = vld [vmem:[#allocation70_spill] sm:$0xff] }
 0x2ae   :  { %5125 = vst [vmem:[#allocation82_spill] sm:$0xff] %v4389_v20  ;;  %5129 = vst [vmem:[#allocation48_spill] sm:$0xff] %v4395_v16  ;;  %v4410_v20 = vmul.f32 %v2462_v13, %v5138_v8  ;;  %v4416_v16 = vmul.f32 %v2462_v13, %v5142_v44  ;;  %v5146_v57 = vld [vmem:[#allocation72_spill] sm:$0xff]  ;;  %v5148_v41 = vld [vmem:[#allocation71_spill] sm:$0xff] }
 0x2af   :  { %5131 = vst [vmem:[#allocation50_spill] sm:$0xff] %v4398_v34  ;;  %5133 = vst [vmem:[#allocation49_spill] sm:$0xff] %v4401_v29  ;;  %v4419_v34 = vmul.f32 %v2462_v13, %v5144_v58  ;;  %v4422_v29 = vmul.f32 %v2462_v13, %v5146_v57  ;;  %v4425_v12 = vmul.f32 %v2462_v13, %v5148_v41  ;;  %v938_v17 = vpop.permute.xlu1 %937  ;;  %v5151_v33 = vld [vmem:[#allocation62_spill] sm:$0xff] }
 0x2b0   :  { %5135 = vst [vmem:[#allocation51_spill] sm:$0xff] %v4404_v54  ;;  %5137 = vst [vmem:[#allocation67_spill] sm:$0xff] %v4407_v35  ;;  %v960_v54 = vadd.f32 %v938_v17, %v4214_v24  ;;  %v961_v8 = vadd.f32 %v938_v17, %v4217_v18  ;;  %v962_v9 = vadd.f32 %v938_v17, %v4220_v2  ;;  %v2472_v44 = vpop.permute.xlu0 %2471 }
 0x2b1   :  { %5139 = vst [vmem:[#allocation69_spill] sm:$0xff] %v4410_v20  ;;  %5141 = vst [vmem:[#allocation68_spill] sm:$0xff] %v4413_v21  ;;  %v963_v21 = vadd.f32 %v938_v17, %v4223_v42  ;;  %v965_v58 = vadd.f32 %v938_v17, %v4229_v0  ;;  %v966_v57 = vadd.f32 %v938_v17, %v4232_v10 }
 0x2b2   :  { %5143 = vst [vmem:[#allocation44_spill] sm:$0xff] %v4416_v16  ;;  %5145 = vst [vmem:[#allocation46_spill] sm:$0xff] %v4419_v34  ;;  %v964_v16 = vadd.f32 %v938_v17, %v4226_v19  ;;  %v995_v13 = vmax.f32 %v960_v54, 0.0  ;;  %v996_v41 = vmax.f32 %v961_v8, 0.0  ;;  %v4438_v42 = vmul.f32 %v2472_v44, %v5151_v33 }
 0x2b3   :  { %5147 = vst [vmem:[#allocation45_spill] sm:$0xff] %v4422_v29  ;;  %5149 = vst [vmem:[#allocation47_spill] sm:$0xff] %v4425_v12  ;;  %v5150_v29 = vld [vmem:[#allocation60_spill] sm:$0xff]  ;;  %v997_v12 = vmax.f32 %v962_v9, 0.0  ;;  %v998_v24 = vmax.f32 %v963_v21, 0.0  ;;  %v1000_v18 = vmax.f32 %v965_v58, 0.0  ;;  %v943_v2 = vpop.permute.xlu1 %942 }
 0x2b4   :  { %v4435_v34 = vmul.f32 %v2472_v44, %v5150_v29  ;;  %v999_v20 = vmax.f32 %v964_v16, 0.0  ;;  %v1001_v35 = vmax.f32 %v966_v57, 0.0  ;;  %1033 = vst [vmem:[%s4930_s3] sm:$0xff] %v995_v13  ;;  %1034 = vst [vmem:[%s4930_s3 + $0x8] sm:$0xff] %v996_v41  ;;  %v967_v19 = vadd.f32 %v943_v2, %v4236_v55  ;;  %v5153_v9 = vld [vmem:[#allocation63_spill] sm:$0xff]  ;;  %v5156_v57 = vld [vmem:[#allocation77_spill] sm:$0xff] }
 0x2b5   :  { %1035 = vst [vmem:[%s4930_s3 + $0x10] sm:$0xff] %v997_v12  ;;  %1036 = vst [vmem:[%s4930_s3 + $0x18] sm:$0xff] %v998_v24  ;;  %v968_v0 = vadd.f32 %v943_v2, %v4239_v5  ;;  %v969_v10 = vadd.f32 %v943_v2, %v4242_v11  ;;  %v970_v33 = vadd.f32 %v943_v2, %v4245_v6  ;;  %v5152_v6 = vld [vmem:[#allocation61_spill] sm:$0xff] }
 0x2b6   :  { %1037 = vst [vmem:[%s4930_s3 + $0x20] sm:$0xff] %v999_v20  ;;  %1038 = vst [vmem:[%s4930_s3 + $0x28] sm:$0xff] %v1000_v18  ;;  %v971_v55 = vadd.f32 %v943_v2, %v4248_v53  ;;  %v972_v5 = vadd.f32 %v943_v2, %v4251_v15  ;;  %v973_v11 = vadd.f32 %v943_v2, %v4254_v7  ;;  %v1002_v16 = vmax.f32 %v967_v19, 0.0  ;;  %v5154_v53 = vld [vmem:[#allocation76_spill] sm:$0xff]  ;;  %v5155_v7 = vld [vmem:[#allocation78_spill] sm:$0xff] }
 0x2b7   :  { %1039 = vst.msk [vmem:[%s4930_s3 + $0x30] sm:$0xff] %vm684_vm5, %v1001_v35  ;;  %v4470_v54 = vmul.f32 %v2472_v44, %v5152_v6  ;;  %v1003_v21 = vmax.f32 %v968_v0, 0.0  ;;  %v1004_v20 = vmax.f32 %v969_v10, 0.0  ;;  %v1005_v29 = vmax.f32 %v970_v33, 0.0 }
 0x2b8   :  { %v1006_v12 = vmax.f32 %v971_v55, 0.0  ;;  %v1007_v17 = vmax.f32 %v972_v5, 0.0  ;;  %v1008_v8 = vmax.f32 %v973_v11, 0.0  ;;  %v4473_v58 = vmul.f32 %v2472_v44, %v5153_v9  ;;  %1040 = vst [vmem:[%s4930_s3 + $0x38] sm:$0xff] %v1002_v16 }
 0x2b9   :  { %1041 = vst [vmem:[%s4930_s3 + $0x40] sm:$0xff] %v1003_v21  ;;  %1042 = vst [vmem:[%s4930_s3 + $0x48] sm:$0xff] %v1004_v20  ;;  %v4488_v15 = vmul.f32 %v2472_v44, %v5154_v53  ;;  %v4491_v35 = vmul.f32 %v2472_v44, %v5155_v7  ;;  %v4494_v13 = vmul.f32 %v2472_v44, %v5156_v57 }
 0x2ba   :  { %1043 = vst [vmem:[%s4930_s3 + $0x50] sm:$0xff] %v1005_v29  ;;  %1044 = vst [vmem:[%s4930_s3 + $0x58] sm:$0xff] %v1006_v12 }
 0x2bb   :  { %1045 = vst [vmem:[%s4930_s3 + $0x60] sm:$0xff] %v1007_v17  ;;  %1046 = vst.msk [vmem:[%s4930_s3 + $0x68] sm:$0xff] %vm684_vm5, %v1008_v8 }
 0x2bc   :  { %v948_v41 = vpop.permute.xlu1 %947 }
 0x2bd   :  { %v974_v24 = vadd.f32 %v948_v41, %v4258_v61  ;;  %v975_v18 = vadd.f32 %v948_v41, %v4261_v62  ;;  %v976_v44 = vadd.f32 %v948_v41, %v4264_v26  ;;  %v977_v2 = vadd.f32 %v948_v41, %v4267_v38 }
 0x2be   :  { %v978_v19 = vadd.f32 %v948_v41, %v4270_v28  ;;  %v979_v0 = vadd.f32 %v948_v41, %v4273_v27  ;;  %v980_v10 = vadd.f32 %v948_v41, %v4276_v40 }
 0x2bf   :  { %v1009_v33 = vmax.f32 %v974_v24, 0.0  ;;  %v1010_v55 = vmax.f32 %v975_v18, 0.0  ;;  %v1011_v5 = vmax.f32 %v976_v44, 0.0  ;;  %v1012_v11 = vmax.f32 %v977_v2, 0.0  ;;  %v5159_v2 = vld [vmem:[#allocation10_spill] sm:$0xff] }
 0x2c0   :  { %v1013_v6 = vmax.f32 %v978_v19, 0.0  ;;  %v1014_v16 = vmax.f32 %v979_v0, 0.0  ;;  %v1015_v21 = vmax.f32 %v980_v10, 0.0  ;;  %v958_v61 = vpop.permute.xlu1 %957  ;;  %v1689_v19 = vmul.f32 %v4333_v49, %v5159_v2  ;;  %v5160_v0 = vld [vmem:[#allocation12_spill] sm:$0xff] }
 0x2c1   :  { %1047 = vst [vmem:[%s4930_s3 + $0x70] sm:$0xff] %v1009_v33  ;;  %1048 = vst [vmem:[%s4930_s3 + $0x78] sm:$0xff] %v1010_v55  ;;  %v988_v62 = vadd.f32 %v958_v61, %v4303_v30  ;;  %v989_v26 = vadd.f32 %v958_v61, %v4306_v36  ;;  %v990_v38 = vadd.f32 %v958_v61, %v4309_v56  ;;  %v5161_v33 = vld [vmem:[#allocation29_spill] sm:$0xff] }
 0x2c2   :  { %1049 = vst [vmem:[%s4930_s3 + $0x80] sm:$0xff] %v1011_v5  ;;  %1050 = vst [vmem:[%s4930_s3 + $0x88] sm:$0xff] %v1012_v11  ;;  %v991_v28 = vadd.f32 %v958_v61, %v4312_v4  ;;  %v992_v27 = vadd.f32 %v958_v61, %v4315_v50  ;;  %v993_v40 = vadd.f32 %v958_v61, %v4318_v63  ;;  %v5162_v5 = vld [vmem:[#allocation31_spill] sm:$0xff] }
 0x2c3   :  { %1051 = vst [vmem:[%s4930_s3 + $0x90] sm:$0xff] %v1013_v6  ;;  %1052 = vst [vmem:[%s4930_s3 + $0x98] sm:$0xff] %v1014_v16  ;;  %v994_v30 = vadd.f32 %v958_v61, %v4321_v46  ;;  %v1023_v36 = vmax.f32 %v988_v62, 0.0  ;;  %v1024_v56 = vmax.f32 %v989_v26, 0.0  ;;  %v1025_v4 = vmax.f32 %v990_v38, 0.0  ;;  %v5163_v6 = vld [vmem:[#allocation30_spill] sm:$0xff] }
 0x2c4   :  { %1053 = vst.msk [vmem:[%s4930_s3 + $0xa0] sm:$0xff] %vm684_vm5, %v1015_v21  ;;  %v1026_v20 = vmax.f32 %v991_v28, 0.0  ;;  %v1027_v29 = vmax.f32 %v992_v27, 0.0  ;;  %v1028_v12 = vmax.f32 %v993_v40, 0.0  ;;  %v953_v8 = vpop.permute.xlu0 %952  ;;  %v1690_v10 = vmul.f32 %v4333_v49, %v5160_v0  ;;  %v5164_v21 = vld [vmem:[#allocation17_spill] sm:$0xff]  ;;  %v5165_v62 = vld [vmem:[#allocation19_spill] sm:$0xff] }
 0x2c5   :  { %v1029_v17 = vmax.f32 %v994_v30, 0.0  ;;  %1061 = vst [vmem:[%s4930_s3 + $0xe0] sm:$0xff] %v1023_v36  ;;  %1062 = vst [vmem:[%s4930_s3 + $0xe8] sm:$0xff] %v1024_v56  ;;  %v981_v50 = vadd.f32 %v953_v8, %v4281_v22  ;;  %v982_v63 = vadd.f32 %v953_v8, %v4284_v32  ;;  %v983_v46 = vadd.f32 %v953_v8, %v4287_v60  ;;  %v5166_v38 = vld [vmem:[#allocation18_spill] sm:$0xff]  ;;  %v5167_v27 = vld [vmem:[#allocation13_spill] sm:$0xff] }
 0x2c6   :  { %1063 = vst [vmem:[%s4930_s3 + $0xf0] sm:$0xff] %v1025_v4  ;;  %1064 = vst [vmem:[%s4930_s3 + $0xf8] sm:$0xff] %v1026_v20  ;;  %v984_v9 = vadd.f32 %v953_v8, %v4290_v39  ;;  %v985_v22 = vadd.f32 %v953_v8, %v4293_v43  ;;  %v986_v32 = vadd.f32 %v953_v8, %v4296_v1  ;;  %v5157_v43 = vld [vmem:[#allocation9_spill] sm:$0xff]  ;;  %v5168_v30 = vld [vmem:[#allocation15_spill] sm:$0xff] }
 0x2c7   :  { %1065 = vst [vmem:[%s4930_s3 + $0x100] sm:$0xff] %v1027_v29  ;;  %1066 = vst [vmem:[%s4930_s3 + $0x108] sm:$0xff] %v1028_v12  ;;  %v987_v60 = vadd.f32 %v953_v8, %v4299_v3  ;;  %v1016_v39 = vmax.f32 %v981_v50, 0.0  ;;  %v1017_v53 = vmax.f32 %v982_v63, 0.0  ;;  %v1018_v7 = vmax.f32 %v983_v46, 0.0  ;;  %v5158_v3 = vld [vmem:[#allocation11_spill] sm:$0xff] }
 0x2c8   :  { %1067 = vst.msk [vmem:[%s4930_s3 + $0x110] sm:$0xff] %vm684_vm5, %v1029_v17  ;;  %v1019_v57 = vmax.f32 %v984_v9, 0.0  ;;  %v1020_v41 = vmax.f32 %v985_v22, 0.0  ;;  %v1021_v24 = vmax.f32 %v986_v32, 0.0  ;;  %v1687_v1 = vmul.f32 %v4333_v49, %v5157_v43  ;;  %v5169_v56 = vld [vmem:[#allocation14_spill] sm:$0xff]  ;;  %v5170_v4 = vld [vmem:[#allocation16_spill] sm:$0xff] }
 0x2c9   :  { %v1022_v18 = vmax.f32 %v987_v60, 0.0  ;;  %1054 = vst [vmem:[%s4930_s3 + $0xa8] sm:$0xff] %v1016_v39  ;;  %1055 = vst [vmem:[%s4930_s3 + $0xb0] sm:$0xff] %v1017_v53  ;;  %v1688_v44 = vmul.f32 %v4333_v49, %v5158_v3  ;;  %v1691_v55 = vmul.f32 %v4333_v49, %v5161_v33  ;;  %v1692_v11 = vmul.f32 %v4333_v49, %v5162_v5  ;;  %v5171_v29 = vld [vmem:[#allocation32_spill] sm:$0xff]  ;;  %v5172_v9 = vld [vmem:[#allocation34_spill] sm:$0xff] }
 0x2ca   :  { %1056 = vst [vmem:[%s4930_s3 + $0xb8] sm:$0xff] %v1018_v7  ;;  %1057 = vst [vmem:[%s4930_s3 + $0xc0] sm:$0xff] %v1019_v57  ;;  %v1693_v16 = vmul.f32 %v4333_v49, %v5163_v6  ;;  %v4609_v61 = vmul.f32 %v4335_v37, %v5164_v21  ;;  %v4613_v26 = vmul.f32 %v4335_v37, %v5165_v62 }
 0x2cb   :  { %1058 = vst [vmem:[%s4930_s3 + $0xc8] sm:$0xff] %v1020_v41  ;;  %1059 = vst [vmem:[%s4930_s3 + $0xd0] sm:$0xff] %v1021_v24  ;;  %v4617_v28 = vmul.f32 %v4335_v37, %v5166_v38  ;;  %v1694_v40 = vmul.f32 %v4337_v31, %v5167_v27  ;;  %v1695_v36 = vmul.f32 %v4337_v31, %v5168_v30  ;;  %v5173_v24 = vld [vmem:[#allocation33_spill] sm:$0xff]  ;;  %v5175_v38 = vld [vmem:[#allocation35_spill] sm:$0xff] }
 0x2cc   :  { %1060 = vst.msk [vmem:[%s4930_s3 + $0xd8] sm:$0xff] %vm684_vm5, %v1022_v18  ;;  %v1696_v49 = vmul.f32 %v4337_v31, %v5169_v56  ;;  %v1697_v20 = vmul.f32 %v4337_v31, %v5170_v4  ;;  %v1698_v12 = vmul.f32 %v4337_v31, %v5171_v29  ;;  %v1699_v22 = vmul.f32 %v4337_v31, %v5172_v9  ;;  %v5176_v56 = vld [vmem:[#allocation21_spill] sm:$0xff]  ;;  %v5177_v4 = vld [vmem:[#allocation23_spill] sm:$0xff]  ;;  %v5178_v29 = vld [vmem:[#allocation22_spill] sm:$0xff] }
 0x2cd   :  { %v1700_v18 = vmul.f32 %v4337_v31, %v5173_v24  ;;  %v1705_v27 = vmul.f32 %v4335_v37, %v5175_v38 }
 0x2d1   :  { %v1725_v17 = vpop.permute.xlu1 %1724 }
 0x2d2   :  { %v1747_v8 = vadd.f32 %v1725_v17, %v1687_v1  ;;  %v1748_v50 = vadd.f32 %v1725_v17, %v1688_v44  ;;  %v1749_v63 = vadd.f32 %v1725_v17, %v1689_v19  ;;  %v1750_v46 = vadd.f32 %v1725_v17, %v1690_v10  ;;  %v5174_v10 = vld [vmem:[#allocation20_spill] sm:$0xff] }
 0x2d3   :  { %v1751_v32 = vadd.f32 %v1725_v17, %v1691_v55  ;;  %v1752_v60 = vadd.f32 %v1725_v17, %v1692_v11  ;;  %v1753_v39 = vadd.f32 %v1725_v17, %v1693_v16  ;;  %v1704_v33 = vmul.f32 %v4335_v37, %v5174_v10  ;;  %v5179_v17 = vld [vmem:[#allocation24_spill] sm:$0xff] }
 0x2d4   :  { %v1782_v53 = vmax.f32 %v1747_v8, 0.0  ;;  %v1783_v7 = vmax.f32 %v1748_v50, 0.0  ;;  %v1784_v57 = vmax.f32 %v1749_v63, 0.0  ;;  %v1785_v41 = vmax.f32 %v1750_v46, 0.0  ;;  %v5180_v50 = vld [vmem:[#allocation37_spill] sm:$0xff]  ;;  %v5181_v46 = vld [vmem:[#allocation38_spill] sm:$0xff] }
 0x2d5   :  { %v1786_v43 = vmax.f32 %v1751_v32, 0.0  ;;  %v1787_v3 = vmax.f32 %v1752_v60, 0.0  ;;  %v1788_v2 = vmax.f32 %v1753_v39, 0.0  ;;  %v1730_v1 = vpop.permute.xlu1 %1729  ;;  %v1711_v8 = vmul.f32 %v4339_v23, %v5179_v17  ;;  %v5183_v60 = vld [vmem:[#allocation39_spill] sm:$0xff] }
 0x2d6   :  { %2766 = vst [vmem:[%s4930_s3 + $0x118] sm:$0xff] %v1782_v53  ;;  %2767 = vst [vmem:[%s4930_s3 + $0x120] sm:$0xff] %v1783_v7  ;;  %v1754_v31 = vadd.f32 %v1730_v1, %v1694_v40  ;;  %v1755_v44 = vadd.f32 %v1730_v1, %v1695_v36  ;;  %v1756_v19 = vadd.f32 %v1730_v1, %v1696_v49 }
 0x2d7   :  { %2768 = vst [vmem:[%s4930_s3 + $0x128] sm:$0xff] %v1784_v57  ;;  %2769 = vst [vmem:[%s4930_s3 + $0x130] sm:$0xff] %v1785_v41  ;;  %v1757_v0 = vadd.f32 %v1730_v1, %v1697_v20  ;;  %v1758_v55 = vadd.f32 %v1730_v1, %v1698_v12  ;;  %v1759_v5 = vadd.f32 %v1730_v1, %v1699_v22  ;;  %v5182_v22 = vld [vmem:[#allocation40_spill] sm:$0xff] }
 0x2d8   :  { %2770 = vst [vmem:[%s4930_s3 + $0x138] sm:$0xff] %v1786_v43  ;;  %2771 = vst [vmem:[%s4930_s3 + $0x140] sm:$0xff] %v1787_v3  ;;  %v1760_v11 = vadd.f32 %v1730_v1, %v1700_v18  ;;  %v1789_v6 = vmax.f32 %v1754_v31, 0.0  ;;  %v1790_v16 = vmax.f32 %v1755_v44, 0.0  ;;  %v1791_v21 = vmax.f32 %v1756_v19, 0.0  ;;  %v5184_v18 = vld [vmem:[#allocation36_spill] sm:$0xff] }
 0x2d9   :  { %2772 = vst.msk [vmem:[%s4930_s3 + $0x148] sm:$0xff] %vm684_vm5, %v1788_v2  ;;  %v1792_v62 = vmax.f32 %v1757_v0, 0.0  ;;  %v1793_v40 = vmax.f32 %v1758_v55, 0.0  ;;  %v1794_v30 = vmax.f32 %v1759_v5, 0.0  ;;  %v1708_v49 = vmul.f32 %v4339_v23, %v5176_v56 }
 0x2da   :  { %v1795_v36 = vmax.f32 %v1760_v11, 0.0  ;;  %v1709_v20 = vmul.f32 %v4339_v23, %v5177_v4  ;;  %v1710_v12 = vmul.f32 %v4339_v23, %v5178_v29  ;;  %2773 = vst [vmem:[%s4930_s3 + $0x150] sm:$0xff] %v1789_v6  ;;  %2774 = vst [vmem:[%s4930_s3 + $0x158] sm:$0xff] %v1790_v16  ;;  %v1706_v63 = vmul.f32 %v4335_v37, %v5180_v50 }
 0x2db   :  { %2775 = vst [vmem:[%s4930_s3 + $0x160] sm:$0xff] %v1791_v21  ;;  %2776 = vst [vmem:[%s4930_s3 + $0x168] sm:$0xff] %v1792_v62  ;;  %v1712_v9 = vmul.f32 %v4339_v23, %v5181_v46  ;;  %v1713_v32 = vmul.f32 %v4339_v23, %v5182_v22  ;;  %v1714_v39 = vmul.f32 %v4339_v23, %v5183_v60  ;;  %v1740_v53 = vpop.permute.xlu1 %1739 }
 0x2dc   :  { %2777 = vst [vmem:[%s4930_s3 + $0x170] sm:$0xff] %v1793_v40  ;;  %2778 = vst [vmem:[%s4930_s3 + $0x178] sm:$0xff] %v1794_v30  ;;  %v1768_v7 = vadd.f32 %v1740_v53, %v1708_v49  ;;  %v1769_v57 = vadd.f32 %v1740_v53, %v1709_v20  ;;  %v1770_v41 = vadd.f32 %v1740_v53, %v1710_v12  ;;  %v5186_v49 = vld [vmem:[#allocation27_spill] sm:$0xff]  ;;  %v5187_v20 = vld [vmem:[#allocation26_spill] sm:$0xff] }
 0x2dd   :  { %2779 = vst.msk [vmem:[%s4930_s3 + $0x180] sm:$0xff] %vm684_vm5, %v1795_v36  ;;  %v1771_v24 = vadd.f32 %v1740_v53, %v1711_v8  ;;  %v1707_v23 = vmul.f32 %v4335_v37, %v5184_v18  ;;  %v1772_v43 = vadd.f32 %v1740_v53, %v1712_v9  ;;  %v1773_v3 = vadd.f32 %v1740_v53, %v1713_v32  ;;  %v1735_v1 = vpop.permute.xlu0 %1734  ;;  %v5185_v36 = vld [vmem:[#allocation25_spill] sm:$0xff]  ;;  %v5188_v12 = vld [vmem:[#allocation28_spill] sm:$0xff]  ;;  %v5191_v9 = vld [vmem:[#allocation42_spill] sm:$0xff] }
 0x2de   :  { %v1774_v2 = vadd.f32 %v1740_v53, %v1714_v39  ;;  %v1803_v31 = vmax.f32 %v1768_v7, 0.0  ;;  %v1804_v44 = vmax.f32 %v1769_v57, 0.0  ;;  %v1805_v19 = vmax.f32 %v1770_v41, 0.0  ;;  %v5189_v8 = vld [vmem:[#allocation41_spill] sm:$0xff] }
 0x2df   :  { %v1806_v0 = vmax.f32 %v1771_v24, 0.0  ;;  %v1807_v10 = vmax.f32 %v1772_v43, 0.0  ;;  %v1808_v55 = vmax.f32 %v1773_v3, 0.0  ;;  %v1761_v11 = vadd.f32 %v1735_v1, %v4609_v61 }
 0x2e0   :  { %v1809_v5 = vmax.f32 %v1774_v2, 0.0  ;;  %2787 = vst [vmem:[%s4930_s3 + $0x1c0] sm:$0xff] %v1803_v31  ;;  %2788 = vst [vmem:[%s4930_s3 + $0x1c8] sm:$0xff] %v1804_v44  ;;  %v1762_v37 = vadd.f32 %v1735_v1, %v4613_v26  ;;  %v1763_v61 = vadd.f32 %v1735_v1, %v4617_v28  ;;  %v1764_v6 = vadd.f32 %v1735_v1, %v1704_v33 }
 0x2e1   :  { %2789 = vst [vmem:[%s4930_s3 + $0x1d0] sm:$0xff] %v1805_v19  ;;  %2790 = vst [vmem:[%s4930_s3 + $0x1d8] sm:$0xff] %v1806_v0  ;;  %v1765_v16 = vadd.f32 %v1735_v1, %v1705_v27  ;;  %v1766_v21 = vadd.f32 %v1735_v1, %v1706_v63  ;;  %v1767_v62 = vadd.f32 %v1735_v1, %v1707_v23  ;;  %v1796_v26 = vmax.f32 %v1761_v11, 0.0  ;;  %v5190_v63 = vld [vmem:[#allocation43_spill] sm:$0xff] }
 0x2e2   :  { %2791 = vst [vmem:[%s4930_s3 + $0x1e0] sm:$0xff] %v1807_v10  ;;  %2792 = vst [vmem:[%s4930_s3 + $0x1e8] sm:$0xff] %v1808_v55  ;;  %v1797_v38 = vmax.f32 %v1762_v37, 0.0  ;;  %v1798_v28 = vmax.f32 %v1763_v61, 0.0  ;;  %v1799_v33 = vmax.f32 %v1764_v6, 0.0  ;;  %v1715_v56 = vmul.f32 %v4341_v14, %v5185_v36  ;;  %v5198_v36 = vld [vmem:[#allocation80_spill] sm:$0xff] }
 0x2e3   :  { %2793 = vst.msk [vmem:[%s4930_s3 + $0x1f0] sm:$0xff] %vm684_vm5, %v1809_v5  ;;  %v1800_v27 = vmax.f32 %v1765_v16, 0.0  ;;  %v1801_v40 = vmax.f32 %v1766_v21, 0.0  ;;  %v1802_v30 = vmax.f32 %v1767_v62, 0.0  ;;  %2780 = vst [vmem:[%s4930_s3 + $0x188] sm:$0xff] %v1796_v26  ;;  %v1716_v4 = vmul.f32 %v4341_v14, %v5186_v49 }
 0x2e4   :  { %v1717_v29 = vmul.f32 %v4341_v14, %v5187_v20  ;;  %v1718_v17 = vmul.f32 %v4341_v14, %v5188_v12  ;;  %2781 = vst [vmem:[%s4930_s3 + $0x190] sm:$0xff] %v1797_v38  ;;  %2782 = vst [vmem:[%s4930_s3 + $0x198] sm:$0xff] %v1798_v28  ;;  %v1719_v50 = vmul.f32 %v4341_v14, %v5189_v8  ;;  %v5192_v38 = vld [vmem:[#allocation4_spill] sm:$0xff] }
 0x2e5   :  { %2783 = vst [vmem:[%s4930_s3 + $0x1a0] sm:$0xff] %v1799_v33  ;;  %2784 = vst [vmem:[%s4930_s3 + $0x1a8] sm:$0xff] %v1800_v27  ;;  %v1720_v46 = vmul.f32 %v4341_v14, %v5190_v63  ;;  %v1721_v22 = vmul.f32 %v4341_v14, %v5191_v9  ;;  %v1745_v32 = vpop.permute.xlu1 %1744  ;;  %v5196_v33 = vld [vmem:[#allocation7_spill] sm:$0xff]  ;;  %v5200_v9 = vld [vmem:[#allocation69_spill] sm:$0xff] }
 0x2e6   :  { %2785 = vst [vmem:[%s4930_s3 + $0x1b0] sm:$0xff] %v1801_v40  ;;  %2786 = vst.msk [vmem:[%s4930_s3 + $0x1b8] sm:$0xff] %vm684_vm5, %v1802_v30  ;;  %v1775_v60 = vadd.f32 %v1745_v32, %v1715_v56  ;;  %v1776_v39 = vadd.f32 %v1745_v32, %v1716_v4  ;;  %v1777_v53 = vadd.f32 %v1745_v32, %v1717_v29  ;;  %v5197_v40 = vld [vmem:[#allocation79_spill] sm:$0xff] }
 0x2e7   :  { %v1778_v7 = vadd.f32 %v1745_v32, %v1718_v17  ;;  %v1779_v57 = vadd.f32 %v1745_v32, %v1719_v50  ;;  %v1780_v41 = vadd.f32 %v1745_v32, %v1720_v46  ;;  %v1781_v24 = vadd.f32 %v1745_v32, %v1721_v22  ;;  %v5199_v63 = vld [vmem:[#allocation67_spill] sm:$0xff]  ;;  %v5201_v32 = vld [vmem:[#allocation68_spill] sm:$0xff] }
 0x2e8   :  { %v1810_v18 = vmax.f32 %v1775_v60, 0.0  ;;  %v1811_v23 = vmax.f32 %v1776_v39, 0.0  ;;  %v1812_v14 = vmax.f32 %v1777_v53, 0.0  ;;  %v5202_v39 = vld [vmem:[#allocation44_spill] sm:$0xff] }
 0x2e9   :  { %v1813_v43 = vmax.f32 %v1778_v7, 0.0  ;;  %v1814_v3 = vmax.f32 %v1779_v57, 0.0  ;;  %v1815_v2 = vmax.f32 %v1780_v41, 0.0  ;;  %v1816_v1 = vmax.f32 %v1781_v24, 0.0  ;;  %v5203_v7 = vld [vmem:[#allocation46_spill] sm:$0xff]  ;;  %v5204_v41 = vld [vmem:[#allocation45_spill] sm:$0xff] }
 0x2ea   :  { %2794 = vst [vmem:[%s4930_s3 + $0x1f8] sm:$0xff] %v1810_v18  ;;  %2795 = vst [vmem:[%s4930_s3 + $0x200] sm:$0xff] %v1811_v23  ;;  %v5205_v18 = vld [vmem:[#allocation47_spill] sm:$0xff] }
 0x2eb   :  { %2796 = vst [vmem:[%s4930_s3 + $0x208] sm:$0xff] %v1812_v14  ;;  %2797 = vst [vmem:[%s4930_s3 + $0x210] sm:$0xff] %v1813_v43 }
 0x2ec   :  { %2798 = vst [vmem:[%s4930_s3 + $0x218] sm:$0xff] %v1814_v3  ;;  %2799 = vst [vmem:[%s4930_s3 + $0x220] sm:$0xff] %v1815_v2 }
 0x2ed   :  { %2800 = vst.msk [vmem:[%s4930_s3 + $0x228] sm:$0xff] %vm684_vm5, %v1816_v1 }
 0x301   :  { %v2512_v31 = vpop.permute.xlu0 %2511 }
 0x302   :  { %v2534_v44 = vadd.f32 %v2512_v31, %v4365_v48  ;;  %v2535_v19 = vadd.f32 %v2512_v31, %v4368_v25  ;;  %v2536_v0 = vadd.f32 %v2512_v31, %v4371_v47  ;;  %v2537_v10 = vadd.f32 %v2512_v31, %v4374_v52  ;;  %v5193_v47 = vld [vmem:[#allocation5_spill] sm:$0xff] }
 0x303   :  { %v2538_v55 = vadd.f32 %v2512_v31, %v4377_v45  ;;  %v2539_v5 = vadd.f32 %v2512_v31, %v4380_v51  ;;  %v2540_v11 = vadd.f32 %v2512_v31, %v4383_v59  ;;  %v2517_v37 = vpop.permute.xlu1 %2516  ;;  %v5194_v45 = vld [vmem:[#allocation6_spill] sm:$0xff]  ;;  %v5195_v59 = vld [vmem:[#allocation8_spill] sm:$0xff] }
 0x304   :  { %v2569_v61 = vmax.f32 %v2534_v44, 0.0  ;;  %v2570_v6 = vmax.f32 %v2535_v19, 0.0  ;;  %v2571_v16 = vmax.f32 %v2536_v0, 0.0  ;;  %v2572_v21 = vmax.f32 %v2537_v10, 0.0  ;;  %v5206_v0 = vld [vmem:[#allocation81_spill] sm:$0xff] }
 0x305   :  { %v2573_v62 = vmax.f32 %v2538_v55, 0.0  ;;  %v2574_v26 = vmax.f32 %v2539_v5, 0.0  ;;  %v2575_v48 = vmax.f32 %v2540_v11, 0.0  ;;  %v2541_v25 = vadd.f32 %v2517_v37, %v5192_v38  ;;  %v5207_v55 = vld [vmem:[#allocation82_spill] sm:$0xff]  ;;  %v5208_v11 = vld [vmem:[#allocation83_spill] sm:$0xff] }
 0x306   :  { %2845 = vst [vmem:[%s4930_s3 + $0x230] sm:$0xff] %v2569_v61  ;;  %2846 = vst [vmem:[%s4930_s3 + $0x238] sm:$0xff] %v2570_v6  ;;  %v2542_v52 = vadd.f32 %v2517_v37, %v5193_v47  ;;  %v2543_v51 = vadd.f32 %v2517_v37, %v5194_v45  ;;  %v2544_v28 = vadd.f32 %v2517_v37, %v5195_v59  ;;  %v5209_v61 = vld [vmem:[#allocation48_spill] sm:$0xff] }
 0x307   :  { %2847 = vst [vmem:[%s4930_s3 + $0x240] sm:$0xff] %v2571_v16  ;;  %2848 = vst [vmem:[%s4930_s3 + $0x248] sm:$0xff] %v2572_v21  ;;  %v2545_v27 = vadd.f32 %v2517_v37, %v5196_v33  ;;  %v2546_v30 = vadd.f32 %v2517_v37, %v5197_v40  ;;  %v2547_v56 = vadd.f32 %v2517_v37, %v5198_v36  ;;  %v2576_v49 = vmax.f32 %v2541_v25, 0.0  ;;  %v5210_v16 = vld [vmem:[#allocation50_spill] sm:$0xff] }
 0x308   :  { %2849 = vst [vmem:[%s4930_s3 + $0x250] sm:$0xff] %v2573_v62  ;;  %2850 = vst [vmem:[%s4930_s3 + $0x258] sm:$0xff] %v2574_v26  ;;  %v2577_v4 = vmax.f32 %v2542_v52, 0.0  ;;  %v2578_v20 = vmax.f32 %v2543_v51, 0.0  ;;  %v2579_v29 = vmax.f32 %v2544_v28, 0.0  ;;  %v5211_v62 = vld [vmem:[#allocation49_spill] sm:$0xff] }
 0x309   :  { %2851 = vst.msk [vmem:[%s4930_s3 + $0x260] sm:$0xff] %vm684_vm5, %v2575_v48  ;;  %v2580_v12 = vmax.f32 %v2545_v27, 0.0  ;;  %v2581_v17 = vmax.f32 %v2546_v30, 0.0  ;;  %v2582_v8 = vmax.f32 %v2547_v56, 0.0  ;;  %2852 = vst [vmem:[%s4930_s3 + $0x268] sm:$0xff] %v2576_v49  ;;  %v2522_v50 = vpop.permute.xlu0 %2521  ;;  %v5212_v48 = vld [vmem:[#allocation51_spill] sm:$0xff] }
 0x30a   :  { %2853 = vst [vmem:[%s4930_s3 + $0x270] sm:$0xff] %v2577_v4  ;;  %2854 = vst [vmem:[%s4930_s3 + $0x278] sm:$0xff] %v2578_v20  ;;  %v2548_v46 = vadd.f32 %v2522_v50, %v5199_v63  ;;  %v2549_v22 = vadd.f32 %v2522_v50, %v5200_v9  ;;  %v2550_v60 = vadd.f32 %v2522_v50, %v5201_v32 }
 0x30b   :  { %2855 = vst [vmem:[%s4930_s3 + $0x280] sm:$0xff] %v2579_v29  ;;  %2856 = vst [vmem:[%s4930_s3 + $0x288] sm:$0xff] %v2580_v12  ;;  %v2551_v53 = vadd.f32 %v2522_v50, %v5202_v39  ;;  %v2552_v57 = vadd.f32 %v2522_v50, %v5203_v7  ;;  %v2553_v24 = vadd.f32 %v2522_v50, %v5204_v41  ;;  %v2527_v14 = vpop.permute.xlu1 %2526 }
 0x30c   :  { %2857 = vst [vmem:[%s4930_s3 + $0x290] sm:$0xff] %v2581_v17  ;;  %2858 = vst.msk [vmem:[%s4930_s3 + $0x298] sm:$0xff] %vm684_vm5, %v2582_v8  ;;  %v2554_v23 = vadd.f32 %v2522_v50, %v5205_v18  ;;  %v2583_v43 = vmax.f32 %v2548_v46, 0.0  ;;  %v2584_v3 = vmax.f32 %v2549_v22, 0.0  ;;  %v2585_v2 = vmax.f32 %v2550_v60, 0.0 }
 0x30d   :  { %v2586_v1 = vmax.f32 %v2551_v53, 0.0  ;;  %v2587_v31 = vmax.f32 %v2552_v57, 0.0  ;;  %v2588_v44 = vmax.f32 %v2553_v24, 0.0  ;;  %v2555_v10 = vadd.f32 %v2527_v14, %v5206_v0 }
 0x30e   :  { %v2589_v19 = vmax.f32 %v2554_v23, 0.0  ;;  %2859 = vst [vmem:[%s4930_s3 + $0x2a0] sm:$0xff] %v2583_v43  ;;  %2860 = vst [vmem:[%s4930_s3 + $0x2a8] sm:$0xff] %v2584_v3  ;;  %v2556_v5 = vadd.f32 %v2527_v14, %v5207_v55  ;;  %v2557_v37 = vadd.f32 %v2527_v14, %v5208_v11  ;;  %v2558_v6 = vadd.f32 %v2527_v14, %v5209_v61 }
 0x30f   :  { %2861 = vst [vmem:[%s4930_s3 + $0x2b0] sm:$0xff] %v2585_v2  ;;  %2862 = vst [vmem:[%s4930_s3 + $0x2b8] sm:$0xff] %v2586_v1  ;;  %v2559_v21 = vadd.f32 %v2527_v14, %v5210_v16  ;;  %v2560_v26 = vadd.f32 %v2527_v14, %v5211_v62  ;;  %v2561_v38 = vadd.f32 %v2527_v14, %v5212_v48  ;;  %v2590_v25 = vmax.f32 %v2555_v10, 0.0 }
 0x310   :  { %2863 = vst [vmem:[%s4930_s3 + $0x2c0] sm:$0xff] %v2587_v31  ;;  %2864 = vst [vmem:[%s4930_s3 + $0x2c8] sm:$0xff] %v2588_v44  ;;  %v2591_v47 = vmax.f32 %v2556_v5, 0.0  ;;  %v2592_v52 = vmax.f32 %v2557_v37, 0.0  ;;  %v2593_v45 = vmax.f32 %v2558_v6, 0.0 }
 0x311   :  { %2865 = vst.msk [vmem:[%s4930_s3 + $0x2d0] sm:$0xff] %vm684_vm5, %v2589_v19  ;;  %v2594_v51 = vmax.f32 %v2559_v21, 0.0  ;;  %v2595_v59 = vmax.f32 %v2560_v26, 0.0  ;;  %v2596_v28 = vmax.f32 %v2561_v38, 0.0  ;;  %2866 = vst [vmem:[%s4930_s3 + $0x2d8] sm:$0xff] %v2590_v25  ;;  %v2532_v33 = vpop.permute.xlu0 %2531 }
 0x312   :  { %2867 = vst [vmem:[%s4930_s3 + $0x2e0] sm:$0xff] %v2591_v47  ;;  %2868 = vst [vmem:[%s4930_s3 + $0x2e8] sm:$0xff] %v2592_v52  ;;  %v2562_v27 = vadd.f32 %v2532_v33, %v4435_v34  ;;  %v2563_v40 = vadd.f32 %v2532_v33, %v4438_v42  ;;  %v2564_v30 = vadd.f32 %v2532_v33, %v4470_v54 }
 0x313   :  { %2869 = vst [vmem:[%s4930_s3 + $0x2f0] sm:$0xff] %v2593_v45  ;;  %2870 = vst [vmem:[%s4930_s3 + $0x2f8] sm:$0xff] %v2594_v51  ;;  %v2565_v36 = vadd.f32 %v2532_v33, %v4473_v58  ;;  %v2566_v56 = vadd.f32 %v2532_v33, %v4488_v15  ;;  %v2567_v49 = vadd.f32 %v2532_v33, %v4491_v35 }
 0x314   :  { %2871 = vst [vmem:[%s4930_s3 + $0x300] sm:$0xff] %v2595_v59  ;;  %2872 = vst.msk [vmem:[%s4930_s3 + $0x308] sm:$0xff] %vm684_vm5, %v2596_v28  ;;  %v2568_v34 = vadd.f32 %v2532_v33, %v4494_v13  ;;  %v2597_v42 = vmax.f32 %v2562_v27, 0.0  ;;  %v2598_v4 = vmax.f32 %v2563_v40, 0.0  ;;  %v2599_v54 = vmax.f32 %v2564_v30, 0.0 }
 0x315   :  { %v2600_v20 = vmax.f32 %v2565_v36, 0.0  ;;  %v2601_v58 = vmax.f32 %v2566_v56, 0.0  ;;  %v2602_v29 = vmax.f32 %v2567_v49, 0.0 }
 0x316   :  { %v2603_v12 = vmax.f32 %v2568_v34, 0.0  ;;  %2873 = vst [vmem:[%s4930_s3 + $0x310] sm:$0xff] %v2597_v42  ;;  %2874 = vst [vmem:[%s4930_s3 + $0x318] sm:$0xff] %v2598_v4 }
 0x317   :  { %2875 = vst [vmem:[%s4930_s3 + $0x320] sm:$0xff] %v2599_v54  ;;  %2876 = vst [vmem:[%s4930_s3 + $0x328] sm:$0xff] %v2600_v20 }
 0x318   :  { %2877 = vst [vmem:[%s4930_s3 + $0x330] sm:$0xff] %v2601_v58  ;;  %2878 = vst [vmem:[%s4930_s3 + $0x338] sm:$0xff] %v2602_v29 }
 0x319   :  { %2879 = vst.msk [vmem:[%s4930_s3 + $0x340] sm:$0xff] %vm684_vm5, %v2603_v12 }

</bundles_post_ra>
